<compile_context>
chip_gen: v7x
topology: tpu7x:2x2x1
jax: 0.10.0
libtpu: 0.0.40
codegen_flags: <defaults>
</compile_context>

<pallas_src>
import math
import functools

import jax
import jax.numpy as jnp
from jax import lax
from jax.experimental import pallas as pl
from jax.experimental.pallas import tpu as pltpu

MAX_TAU = 50
EPS = 1e-6                     # Net.epsilon
BETA = 0.0                     # Net.beta[0]
DIM = 2 * MAX_TAU + 1          # 101
DP = 128                       # padded feature width (lane-dense)
DH = 6                         # dim_head
FF_MULT = 1
CONV_EXPANSION = 2
CONV_KERNEL = 3
INNER = CONV_EXPANSION * DIM   # 202
IP = 256                       # padded conv inner width
NOUT_P = 128                   # padded head output width
MAX_POS_EMB = 512
LN_EPS = 1e-5
BN_EPS = 1e-5
NEG = -1e30


# ----------------------------------------------------------------------------
# Fused ConformerBlock + head kernel (single grid step, batch folded into rows)
# ----------------------------------------------------------------------------
def _net_kernel(nseq, B, dh,
                x_ref, vecd_ref, veci_ref, wdd_ref, wpglu_ref, wp2_ref,
                wqkv_ref, wo_ref, selmask_ref, krelt_ref,
                bmask_ref, shifts_ref, headbn_ref, wstk_ref, bout_ref,
                o_ref):
    inv_dim = 1.0 / float(DIM)
    pad_extra = float(DP - DIM)

    VD = vecd_ref[...]           # (16, DP)  packed dim-width vectors
    VI = veci_ref[...]           # (8, IP)   packed inner-width vectors

    def vd(i):
        return VD[i:i + 1, :]

    def vi(i):
        return VI[i:i + 1, :]

    def ln(v, gi, bi):
        # LayerNorm over the real 101 features; padded columns stay exactly 0
        # because gamma/beta are zero there and the variance is pad-corrected.
        mu = jnp.sum(v, axis=-1, keepdims=True) * inv_dim
        d = v - mu
        var = (jnp.sum(d * d, axis=-1, keepdims=True) - pad_extra * mu * mu) * inv_dim
        return d * lax.rsqrt(var + LN_EPS) * vd(gi) + vd(bi)

    def silu(v):
        return v * jax.nn.sigmoid(v)

    def mm(a, b):
        return jnp.dot(a, b, preferred_element_type=jnp.float32)

    x = x_ref[...].astype(jnp.float32)                  # (rows, DP)

    # --- FeedForward #1 (half-step residual) ---
    h = ln(x, 0, 1)
    h = silu(mm(h, wdd_ref[0]) + vd(2))
    h = mm(h, wdd_ref[1]) + vd(3)
    x = x + 0.5 * h

    # --- Self attention (heads=1), batch folded via block-diagonal -inf mask ---
    h = ln(x, 4, 5)
    qkv = mm(h, wqkv_ref[...])                          # (rows, nseq*dh + 2*dh)
    qs = qkv[:, 0:nseq * dh]                            # pre-scaled q replicated per block
    q = qkv[:, 0:dh]                                    # (rows, dh), pre-scaled by dh**-0.5
    k = qkv[:, nseq * dh:nseq * dh + dh]
    v = qkv[:, nseq * dh + dh:nseq * dh + 2 * dh]
    dots = lax.dot_general(q, k, (((1,), (1,)), ((), ())),
                           preferred_element_type=jnp.float32)        # q @ k^T
    # Shaw rel-pos bias as one matmul against a precomputed table.
    pos = mm(qs * selmask_ref[...], krelt_ref[...])     # (rows, rows)
    dots = dots + pos + bmask_ref[...]
    dots = dots - jnp.max(dots, axis=-1, keepdims=True)
    pattn = jnp.exp(dots)
    pattn = pattn * pl.reciprocal(jnp.sum(pattn, axis=-1, keepdims=True), approx=True)
    att = mm(pattn, v)                                  # (rows, dh)
    x = x + mm(att, wo_ref[...]) + vd(6)

    # --- Convolution module ---
    h = ln(x, 7, 8)
    ag = mm(h, wpglu_ref[...])                          # fused pointwise (value|gate)
    a = ag[:, 0:IP] + vi(6)
    g = ag[:, IP:2 * IP] + vi(7)
    h = a * jax.nn.sigmoid(g)                           # GLU, (rows, IP)
    # depthwise conv (kernel=3, same zero padding) via precomputed shift matrices
    prev = mm(shifts_ref[0], h)                         # h at seq position t-1
    nxt = mm(shifts_ref[1], h)                          # h at seq position t+1
    h = prev * vi(0) + h * vi(1) + nxt * vi(2) + vi(3)
    # BatchNorm1d eval (running mean 0, var 1): gamma/sqrt(1+eps) prefolded.
    h = h * vi(4) + vi(5)
    h = silu(h)
    h = mm(h, wp2_ref[...]) + vd(9)
    x = x + h

    # --- FeedForward #2 (half-step residual) ---
    h = ln(x, 10, 11)
    h = silu(mm(h, wdd_ref[2]) + vd(12))
    h = mm(h, wdd_ref[3]) + vd(13)
    x = x + 0.5 * h

    # --- Post LayerNorm ---
    x = ln(x, 14, 15)

    # --- Fused head: BN(eval, prefolded) -> LeakyReLU(0.2) -> Linear -> softmax ---
    z = x * headbn_ref[0] + headbn_ref[1]
    z = jnp.where(z > 0, z, 0.2 * z)
    logits = mm(z[0:B, :], wstk_ref[0])                 # seq position 0
    for n in range(1, nseq):                            # static unroll, nseq small
        logits = logits + mm(z[n * B:(n + 1) * B, :], wstk_ref[n])
    logits = logits + bout_ref[...]                     # padded lanes carry -1e30
    logits = logits - jnp.max(logits, axis=-1, keepdims=True)
    e = jnp.exp(logits)
    o_ref[...] = e / jnp.sum(e, axis=-1, keepdims=True)  # exact for output probs


def conformer_head_call(x_rows, p, nseq, B):
    args = [x_rows, p['vecd'], p['veci'], p['wdd'], p['wpglu'], p['wp2'],
            p['wqkv'], p['wo'], p['selmask'], p['krelt'],
            p['bmask'], p['shifts'], p['headbn'], p['wstk'], p['bout']]

    def full_spec(a):
        nd = a.ndim
        return pl.BlockSpec(a.shape, lambda i, _nd=nd: (0,) * _nd)

    return pl.pallas_call(
        functools.partial(_net_kernel, nseq, B, DH),
        grid=(1,),
        in_specs=[full_spec(a) for a in args],
        out_specs=pl.BlockSpec((B, NOUT_P), lambda i: (0, 0)),
        out_shape=jax.ShapeDtypeStruct((B, NOUT_P), jnp.float32),
        compiler_params=pltpu.CompilerParams(dimension_semantics=("arbitrary",)),
    )(*args)


# ----------------------------------------------------------------------------
# Full forward pass (FFT glue in plain XLA, everything else in one Pallas call)
# ----------------------------------------------------------------------------
def net_forward(params, x1, x2, x3, *, n_outputs):
    B, S, L = x1.shape
    nseq = 3 * S
    n = 2 * L                                  # equal lengths -> same n for all pairs
    # TODO(synk): rfft/irfft have no Pallas primitive; FFT glue stays in XLA.
    X = jnp.fft.rfft(jnp.stack([x1, x2, x3], axis=0), n=n)      # one batched rfft
    X1, X2, X3 = X[0], X[1], X[2]
    G = jnp.concatenate([X1 * jnp.conj(X2),
                         X1 * jnp.conj(X3),
                         X2 * jnp.conj(X3)], axis=1)             # (B, nseq, nfreq)
    if BETA != 0.0:                            # PHAT weighting; exact identity for beta==0
        G = G * jnp.power(1.0 / (jnp.abs(G) + EPS), BETA)
    cc = jnp.fft.irfft(G, n=n)                                   # one batched irfft
    cc = jnp.concatenate([cc[:, :, -MAX_TAU:], cc[:, :, :MAX_TAU + 1]], axis=-1)
    # lane-pad 101 -> 128 and switch to (seq, batch)-major rows for the kernel
    cc = jnp.pad(cc.astype(jnp.float32), ((0, 0), (0, 0), (0, DP - DIM)))
    x_rows = jnp.transpose(cc, (1, 0, 2)).reshape(nseq * B, DP)
    probs = conformer_head_call(x_rows, params, nseq, B)         # Pallas
    return probs[:, :n_outputs]


# ----------------------------------------------------------------------------
# Deterministic parameter init + packing into lane-padded kernel slabs
# ----------------------------------------------------------------------------
def init_params(key, num_stacked, n_outputs, batch_size):
    nseq = 3 * num_stacked
    B = batch_size
    rows = nseq * B
    dim, dh, inner = DIM, DH, INNER
    size = dim * nseq

    keys = jax.random.split(key, 20)
    kit = iter(keys)

    def lin_w(k, fin, fout):
        return jax.random.normal(k, (fin, fout), jnp.float32) / math.sqrt(fin)

    def pad2(w, r, c):
        return jnp.pad(w, ((0, r - w.shape[0]), (0, c - w.shape[1])))

    def padrow(v, c):
        v = jnp.asarray(v, jnp.float32).reshape(1, -1)
        return jnp.pad(v, ((0, 0), (0, c - v.shape[1])))

    # raw weights (LN gamma=1/beta=0, BN gamma=1/beta=0, biases zero, weights random)
    ff1_w1 = lin_w(next(kit), dim, dim * FF_MULT)
    ff1_w2 = lin_w(next(kit), dim * FF_MULT, dim)
    ff2_w1 = lin_w(next(kit), dim, dim * FF_MULT)
    ff2_w2 = lin_w(next(kit), dim * FF_MULT, dim)
    wq = lin_w(next(kit), dim, dh)
    wk = lin_w(next(kit), dim, dh)
    wv = lin_w(next(kit), dim, dh)
    wo = lin_w(next(kit), dh, dim)
    rel_table = jax.random.normal(next(kit), (2 * MAX_POS_EMB + 1, dh), jnp.float32)
    wpa = lin_w(next(kit), dim, inner)
    wpg = lin_w(next(kit), dim, inner)
    wdw = jax.random.normal(next(kit), (CONV_KERNEL, inner), jnp.float32) / math.sqrt(CONV_KERNEL)
    wp2 = lin_w(next(kit), inner, dim)
    head_w = lin_w(next(kit), size, n_outputs)

    zeros_dim = jnp.zeros((dim,), jnp.float32)
    ones_dim = jnp.ones((dim,), jnp.float32)
    zeros_inner = jnp.zeros((inner,), jnp.float32)
    ones_inner = jnp.ones((inner,), jnp.float32)
    bn_scale = 1.0 / math.sqrt(1.0 + BN_EPS)       # eval BN with running var = 1

    p = {}

    # packed dim-width vectors (16, DP)
    p['vecd'] = jnp.concatenate([
        padrow(ones_dim, DP),      # 0  ff1 LN gamma
        padrow(zeros_dim, DP),     # 1  ff1 LN beta
        padrow(zeros_dim, DP),     # 2  ff1 linear1 bias
        padrow(zeros_dim, DP),     # 3  ff1 linear2 bias
        padrow(ones_dim, DP),      # 4  attn LN gamma
        padrow(zeros_dim, DP),     # 5  attn LN beta
        padrow(zeros_dim, DP),     # 6  attn out bias
        padrow(ones_dim, DP),      # 7  conv LN gamma
        padrow(zeros_dim, DP),     # 8  conv LN beta
        padrow(zeros_dim, DP),     # 9  conv pointwise2 bias
        padrow(ones_dim, DP),      # 10 ff2 LN gamma
        padrow(zeros_dim, DP),     # 11 ff2 LN beta
        padrow(zeros_dim, DP),     # 12 ff2 linear1 bias
        padrow(zeros_dim, DP),     # 13 ff2 linear2 bias
        padrow(ones_dim, DP),      # 14 post LN gamma
        padrow(zeros_dim, DP),     # 15 post LN beta
    ], axis=0)

    # packed inner-width vectors (8, IP)
    p['veci'] = jnp.concatenate([
        padrow(wdw[0], IP),                        # 0 depthwise w[k-1]
        padrow(wdw[1], IP),                        # 1 depthwise w[k]
        padrow(wdw[2], IP),                        # 2 depthwise w[k+1]
        padrow(zeros_inner, IP),                   # 3 depthwise bias
        padrow(ones_inner * bn_scale, IP),         # 4 BN gamma / sqrt(var+eps)
        padrow(zeros_inner, IP),                   # 5 BN beta
        padrow(zeros_inner, IP),                   # 6 pointwise value bias
        padrow(zeros_inner, IP),                   # 7 pointwise gate bias
    ], axis=0)

    # stacked weight cubes
    p['wdd'] = jnp.stack([pad2(ff1_w1, DP, DP), pad2(ff1_w2, DP, DP),
                          pad2(ff2_w1, DP, DP), pad2(ff2_w2, DP, DP)], axis=0)
    p['wpglu'] = jnp.concatenate([pad2(wpa, DP, IP), pad2(wpg, DP, IP)], axis=1)  # (DP, 2*IP)
    p['wp2'] = pad2(wp2, IP, DP)

    # attention weights: q repeated per seq block with 1/sqrt(dh) pre-folded,
    # then k and v appended -> single fused projection matmul in the kernel.
    wq_pad = pad2(wq * (dh ** -0.5), DP, dh)
    wqrep = jnp.tile(wq_pad, (1, nseq))                            # (DP, nseq*dh)
    p['wqkv'] = jnp.concatenate([wqrep, pad2(wk, DP, dh), pad2(wv, DP, dh)], axis=1)
    p['wo'] = pad2(wo, dh, DP)

    # attention constants (row order m = n*B + b)
    n_of_row = jnp.arange(rows) // B
    b_of_row = jnp.arange(rows) % B
    col_block = jnp.arange(nseq * dh) // dh
    p['selmask'] = (n_of_row[:, None] == col_block[None, :]).astype(jnp.float32)
    idx = jnp.arange(nseq)
    dist = jnp.clip(idx[:, None] - idx[None, :], -MAX_POS_EMB, MAX_POS_EMB) + MAX_POS_EMB
    rel = rel_table[dist]                                          # (nseq, nseq, dh)
    krel = jnp.transpose(rel, (0, 2, 1)).reshape(nseq * dh, nseq)  # [n*dh+d, r]
    p['krelt'] = jnp.repeat(krel, B, axis=1)                       # [n*dh+d, r*B+b]
    p['bmask'] = jnp.where(b_of_row[:, None] == b_of_row[None, :],
                           0.0, NEG).astype(jnp.float32)

    # depthwise-conv shift matrices (seq stride = B in row space; zero at edges)
    m = jnp.arange(rows)
    sh_prev = (m[None, :] == m[:, None] - B).astype(jnp.float32)
    sh_next = (m[None, :] == m[:, None] + B).astype(jnp.float32)
    p['shifts'] = jnp.stack([sh_prev, sh_next], axis=0)

    # head constants: BatchNorm1d(size) eval prefolded, Linear weight reshaped per seq pos
    head_bn_g = jnp.ones((size,), jnp.float32) * bn_scale
    head_bn_b = jnp.zeros((size,), jnp.float32)
    gbn = jnp.pad(head_bn_g.reshape(nseq, dim), ((0, 0), (0, DP - dim)))
    bbn = jnp.pad(head_bn_b.reshape(nseq, dim), ((0, 0), (0, DP - dim)))
    p['headbn'] = jnp.stack([jnp.repeat(gbn, B, axis=0),
                             jnp.repeat(bbn, B, axis=0)], axis=0)  # (2, rows, DP)
    p['wstk'] = jnp.pad(head_w.reshape(nseq, dim, n_outputs),
                        ((0, 0), (0, DP - dim), (0, NOUT_P - n_outputs)))
    head_b = jnp.zeros((n_outputs,), jnp.float32)
    p['bout'] = jnp.concatenate(
        [head_b, jnp.full((NOUT_P - n_outputs,), NEG, jnp.float32)]).reshape(1, NOUT_P)

    return p


if __name__ == "__main__":
    key = jax.random.PRNGKey(0)
    B, num_stacked, L = 2, 2, 64
    n_outputs = 8
    k1, k2, k3, kp = jax.random.split(key, 4)
    x1 = jax.random.normal(k1, (B, num_stacked, L), jnp.float32)
    x2 = jax.random.normal(k2, (B, num_stacked, L), jnp.float32)
    x3 = jax.random.normal(k3, (B, num_stacked, L), jnp.float32)
    params = init_params(kp, num_stacked, n_outputs, B)

    fwd = jax.jit(functools.partial(net_forward, n_outputs=n_outputs))
    out = fwd(params, x1, x2, x3)
    out = jax.block_until_ready(out)
    assert out.shape == (B, n_outputs)
    assert bool(jnp.all(jnp.isfinite(out)))
    print("KERNEL_OK")
</pallas_src>

<mosaic_0001>
module attributes {stable_mosaic.version = 11 : i64} {
  func.func @_net_kernel(%arg0: i32, %arg1: memref<12x128xf32, #tpu.memory_space<vmem>>, %arg2: memref<16x128xf32, #tpu.memory_space<vmem>>, %arg3: memref<8x256xf32, #tpu.memory_space<vmem>>, %arg4: memref<4x128x128xf32, #tpu.memory_space<vmem>>, %arg5: memref<128x512xf32, #tpu.memory_space<vmem>>, %arg6: memref<256x128xf32, #tpu.memory_space<vmem>>, %arg7: memref<128x48xf32, #tpu.memory_space<vmem>>, %arg8: memref<6x128xf32, #tpu.memory_space<vmem>>, %arg9: memref<12x36xf32, #tpu.memory_space<vmem>>, %arg10: memref<36x12xf32, #tpu.memory_space<vmem>>, %arg11: memref<12x12xf32, #tpu.memory_space<vmem>>, %arg12: memref<2x12x12xf32, #tpu.memory_space<vmem>>, %arg13: memref<2x12x128xf32, #tpu.memory_space<vmem>>, %arg14: memref<6x128x128xf32, #tpu.memory_space<vmem>>, %arg15: memref<1x128xf32, #tpu.memory_space<vmem>>, %arg16: memref<2x128xf32, #tpu.memory_space<vmem>>) attributes {dimension_semantics = [#tpu.dimension_semantics<arbitrary>], iteration_bounds = array<i64: 1>, scalar_prefetch = 0 : i64, scratch_operands = 0 : i64, tpu.core_type = #tpu.core_type<tc>, window_params = [{pipeline_mode = #tpu.pipeline_mode<synchronous>, transform_indices = @transform_0, window_bounds = array<i64: 12, 128>}, {pipeline_mode = #tpu.pipeline_mode<synchronous>, transform_indices = @transform_1, window_bounds = array<i64: 16, 128>}, {pipeline_mode = #tpu.pipeline_mode<synchronous>, transform_indices = @transform_2, window_bounds = array<i64: 8, 256>}, {pipeline_mode = #tpu.pipeline_mode<synchronous>, transform_indices = @transform_3, window_bounds = array<i64: 4, 128, 128>}, {pipeline_mode = #tpu.pipeline_mode<synchronous>, transform_indices = @transform_4, window_bounds = array<i64: 128, 512>}, {pipeline_mode = #tpu.pipeline_mode<synchronous>, transform_indices = @transform_5, window_bounds = array<i64: 256, 128>}, {pipeline_mode = #tpu.pipeline_mode<synchronous>, transform_indices = @transform_6, window_bounds = array<i64: 128, 48>}, {pipeline_mode = #tpu.pipeline_mode<synchronous>, transform_indices = @transform_7, window_bounds = array<i64: 6, 128>}, {pipeline_mode = #tpu.pipeline_mode<synchronous>, transform_indices = @transform_8, window_bounds = array<i64: 12, 36>}, {pipeline_mode = #tpu.pipeline_mode<synchronous>, transform_indices = @transform_9, window_bounds = array<i64: 36, 12>}, {pipeline_mode = #tpu.pipeline_mode<synchronous>, transform_indices = @transform_10, window_bounds = array<i64: 12, 12>}, {pipeline_mode = #tpu.pipeline_mode<synchronous>, transform_indices = @transform_11, window_bounds = array<i64: 2, 12, 12>}, {pipeline_mode = #tpu.pipeline_mode<synchronous>, transform_indices = @transform_12, window_bounds = array<i64: 2, 12, 128>}, {pipeline_mode = #tpu.pipeline_mode<synchronous>, transform_indices = @transform_13, window_bounds = array<i64: 6, 128, 128>}, {pipeline_mode = #tpu.pipeline_mode<synchronous>, transform_indices = @transform_14, window_bounds = array<i64: 1, 128>}, {pipeline_mode = #tpu.pipeline_mode<synchronous>, transform_indices = @transform_15, window_bounds = array<i64: 2, 128>}]} {
    %c0 = arith.constant 0 : index
    %c0_0 = arith.constant 0 : index
    %0 = vector.load %arg2[%c0, %c0_0] : memref<16x128xf32, #tpu.memory_space<vmem>>, vector<16x128xf32>
    %c0_1 = arith.constant 0 : index
    %c0_2 = arith.constant 0 : index
    %1 = vector.load %arg3[%c0_1, %c0_2] : memref<8x256xf32, #tpu.memory_space<vmem>>, vector<8x256xf32>
    %c0_3 = arith.constant 0 : index
    %c0_4 = arith.constant 0 : index
    %2 = vector.load %arg1[%c0_3, %c0_4] : memref<12x128xf32, #tpu.memory_space<vmem>>, vector<12x128xf32>
    %cst = arith.constant dense<0.000000e+00> : vector<12xf32>
    %3 = vector.multi_reduction <add>, %2, %cst [1] : vector<12x128xf32> to vector<12xf32>
    %4 = vector.shape_cast %3 : vector<12xf32> to vector<12x1xf32>
    %cst_5 = arith.constant 9.900990e-03 : f32
    %5 = vector.broadcast %cst_5 : f32 to vector<12x1xf32>
    %6 = arith.mulf %4, %5 : vector<12x1xf32>
    %7 = vector.broadcast %6 : vector<12x1xf32> to vector<12x128xf32>
    %8 = arith.subf %2, %7 : vector<12x128xf32>
    %9 = arith.mulf %8, %8 : vector<12x128xf32>
    %cst_6 = arith.constant dense<0.000000e+00> : vector<12xf32>
    %10 = vector.multi_reduction <add>, %9, %cst_6 [1] : vector<12x128xf32> to vector<12xf32>
    %11 = vector.shape_cast %10 : vector<12xf32> to vector<12x1xf32>
    %cst_7 = arith.constant 2.700000e+01 : f32
    %12 = vector.broadcast %cst_7 : f32 to vector<12x1xf32>
    %13 = arith.mulf %12, %6 : vector<12x1xf32>
    %14 = arith.mulf %13, %6 : vector<12x1xf32>
    %15 = arith.subf %11, %14 : vector<12x1xf32>
    %cst_8 = arith.constant 9.900990e-03 : f32
    %16 = vector.broadcast %cst_8 : f32 to vector<12x1xf32>
    %17 = arith.mulf %15, %16 : vector<12x1xf32>
    %cst_9 = arith.constant 9.99999974E-6 : f32
    %18 = vector.broadcast %cst_9 : f32 to vector<12x1xf32>
    %19 = arith.addf %17, %18 : vector<12x1xf32>
    %20 = math.rsqrt %19 : vector<12x1xf32>
    %21 = vector.broadcast %20 : vector<12x1xf32> to vector<12x128xf32>
    %22 = arith.mulf %8, %21 : vector<12x128xf32>
    %23 = vector.extract_strided_slice %0 {offsets = [0, 0], sizes = [1, 128], strides = [1, 1]} : vector<16x128xf32> to vector<1x128xf32>
    %24 = vector.broadcast %23 : vector<1x128xf32> to vector<12x128xf32>
    %25 = arith.mulf %22, %24 : vector<12x128xf32>
    %26 = vector.extract_strided_slice %0 {offsets = [1, 0], sizes = [1, 128], strides = [1, 1]} : vector<16x128xf32> to vector<1x128xf32>
    %27 = vector.broadcast %26 : vector<1x128xf32> to vector<12x128xf32>
    %28 = arith.addf %25, %27 : vector<12x128xf32>
    %c0_10 = arith.constant 0 : index
    %c0_11 = arith.constant 0 : index
    %c0_12 = arith.constant 0 : index
    %29 = vector.load %arg4[%c0_10, %c0_11, %c0_12] : memref<4x128x128xf32, #tpu.memory_space<vmem>>, vector<1x128x128xf32>
    %30 = vector.shape_cast %29 : vector<1x128x128xf32> to vector<128x128xf32>
    %cst_13 = arith.constant dense<0.000000e+00> : vector<12x128xf32>
    %31 = tpu.matmul %28, %30, %cst_13 {dimension_numbers = #tpu.dot_dimension_numbers<[1], [0], [0], [1], [0, 0, 1, 1], [], []>} : vector<12x128xf32>, vector<128x128xf32>, vector<12x128xf32> -> vector<12x128xf32>
    %32 = vector.extract_strided_slice %0 {offsets = [2, 0], sizes = [1, 128], strides = [1, 1]} : vector<16x128xf32> to vector<1x128xf32>
    %33 = vector.broadcast %32 : vector<1x128xf32> to vector<12x128xf32>
    %34 = arith.addf %31, %33 : vector<12x128xf32>
    %35 = arith.negf %34 : vector<12x128xf32>
    %36 = math.exp %35 : vector<12x128xf32>
    %cst_14 = arith.constant 1.000000e+00 : f32
    %37 = vector.broadcast %cst_14 : f32 to vector<12x128xf32>
    %38 = arith.addf %37, %36 : vector<12x128xf32>
    %39 = arith.divf %37, %38 : vector<12x128xf32>
    %40 = arith.mulf %34, %39 : vector<12x128xf32>
    %c1 = arith.constant 1 : index
    %c0_15 = arith.constant 0 : index
    %c0_16 = arith.constant 0 : index
    %41 = vector.load %arg4[%c1, %c0_15, %c0_16] : memref<4x128x128xf32, #tpu.memory_space<vmem>>, vector<1x128x128xf32>
    %42 = vector.shape_cast %41 : vector<1x128x128xf32> to vector<128x128xf32>
    %cst_17 = arith.constant dense<0.000000e+00> : vector<12x128xf32>
    %43 = tpu.matmul %40, %42, %cst_17 {dimension_numbers = #tpu.dot_dimension_numbers<[1], [0], [0], [1], [0, 0, 1, 1], [], []>} : vector<12x128xf32>, vector<128x128xf32>, vector<12x128xf32> -> vector<12x128xf32>
    %44 = vector.extract_strided_slice %0 {offsets = [3, 0], sizes = [1, 128], strides = [1, 1]} : vector<16x128xf32> to vector<1x128xf32>
    %45 = vector.broadcast %44 : vector<1x128xf32> to vector<12x128xf32>
    %46 = arith.addf %43, %45 : vector<12x128xf32>
    %cst_18 = arith.constant 5.000000e-01 : f32
    %47 = vector.broadcast %cst_18 : f32 to vector<12x128xf32>
    %48 = arith.mulf %47, %46 : vector<12x128xf32>
    %49 = arith.addf %2, %48 : vector<12x128xf32>
    %cst_19 = arith.constant dense<0.000000e+00> : vector<12xf32>
    %50 = vector.multi_reduction <add>, %49, %cst_19 [1] : vector<12x128xf32> to vector<12xf32>
    %51 = vector.shape_cast %50 : vector<12xf32> to vector<12x1xf32>
    %cst_20 = arith.constant 9.900990e-03 : f32
    %52 = vector.broadcast %cst_20 : f32 to vector<12x1xf32>
    %53 = arith.mulf %51, %52 : vector<12x1xf32>
    %54 = vector.broadcast %53 : vector<12x1xf32> to vector<12x128xf32>
    %55 = arith.subf %49, %54 : vector<12x128xf32>
    %56 = arith.mulf %55, %55 : vector<12x128xf32>
    %cst_21 = arith.constant dense<0.000000e+00> : vector<12xf32>
    %57 = vector.multi_reduction <add>, %56, %cst_21 [1] : vector<12x128xf32> to vector<12xf32>
    %58 = vector.shape_cast %57 : vector<12xf32> to vector<12x1xf32>
    %cst_22 = arith.constant 2.700000e+01 : f32
    %59 = vector.broadcast %cst_22 : f32 to vector<12x1xf32>
    %60 = arith.mulf %59, %53 : vector<12x1xf32>
    %61 = arith.mulf %60, %53 : vector<12x1xf32>
    %62 = arith.subf %58, %61 : vector<12x1xf32>
    %cst_23 = arith.constant 9.900990e-03 : f32
    %63 = vector.broadcast %cst_23 : f32 to vector<12x1xf32>
    %64 = arith.mulf %62, %63 : vector<12x1xf32>
    %cst_24 = arith.constant 9.99999974E-6 : f32
    %65 = vector.broadcast %cst_24 : f32 to vector<12x1xf32>
    %66 = arith.addf %64, %65 : vector<12x1xf32>
    %67 = math.rsqrt %66 : vector<12x1xf32>
    %68 = vector.broadcast %67 : vector<12x1xf32> to vector<12x128xf32>
    %69 = arith.mulf %55, %68 : vector<12x128xf32>
    %70 = vector.extract_strided_slice %0 {offsets = [4, 0], sizes = [1, 128], strides = [1, 1]} : vector<16x128xf32> to vector<1x128xf32>
    %71 = vector.broadcast %70 : vector<1x128xf32> to vector<12x128xf32>
    %72 = arith.mulf %69, %71 : vector<12x128xf32>
    %73 = vector.extract_strided_slice %0 {offsets = [5, 0], sizes = [1, 128], strides = [1, 1]} : vector<16x128xf32> to vector<1x128xf32>
    %74 = vector.broadcast %73 : vector<1x128xf32> to vector<12x128xf32>
    %75 = arith.addf %72, %74 : vector<12x128xf32>
    %c0_25 = arith.constant 0 : index
    %c0_26 = arith.constant 0 : index
    %76 = vector.load %arg7[%c0_25, %c0_26] : memref<128x48xf32, #tpu.memory_space<vmem>>, vector<128x48xf32>
    %cst_27 = arith.constant dense<0.000000e+00> : vector<12x48xf32>
    %77 = tpu.matmul %75, %76, %cst_27 {dimension_numbers = #tpu.dot_dimension_numbers<[1], [0], [0], [1], [0, 0, 1, 1], [], []>} : vector<12x128xf32>, vector<128x48xf32>, vector<12x48xf32> -> vector<12x48xf32>
    %78 = vector.extract_strided_slice %77 {offsets = [0, 0], sizes = [12, 36], strides = [1, 1]} : vector<12x48xf32> to vector<12x36xf32>
    %79 = vector.extract_strided_slice %77 {offsets = [0, 0], sizes = [12, 6], strides = [1, 1]} : vector<12x48xf32> to vector<12x6xf32>
    %80 = vector.extract_strided_slice %77 {offsets = [0, 36], sizes = [12, 6], strides = [1, 1]} : vector<12x48xf32> to vector<12x6xf32>
    %81 = vector.extract_strided_slice %77 {offsets = [0, 42], sizes = [12, 6], strides = [1, 1]} : vector<12x48xf32> to vector<12x6xf32>
    %cst_28 = arith.constant dense<0.000000e+00> : vector<12x12xf32>
    %82 = tpu.matmul %79, %80, %cst_28 {dimension_numbers = #tpu.dot_dimension_numbers<[1], [1], [0], [0], [0, 0, 1, 0], [], []>} : vector<12x6xf32>, vector<12x6xf32>, vector<12x12xf32> -> vector<12x12xf32>
    %c0_29 = arith.constant 0 : index
    %c0_30 = arith.constant 0 : index
    %83 = vector.load %arg9[%c0_29, %c0_30] : memref<12x36xf32, #tpu.memory_space<vmem>>, vector<12x36xf32>
    %84 = arith.mulf %78, %83 : vector<12x36xf32>
    %c0_31 = arith.constant 0 : index
    %c0_32 = arith.constant 0 : index
    %85 = vector.load %arg10[%c0_31, %c0_32] : memref<36x12xf32, #tpu.memory_space<vmem>>, vector<36x12xf32>
    %cst_33 = arith.constant dense<0.000000e+00> : vector<12x12xf32>
    %86 = tpu.matmul %84, %85, %cst_33 {dimension_numbers = #tpu.dot_dimension_numbers<[1], [0], [0], [1], [0, 0, 1, 1], [], []>} : vector<12x36xf32>, vector<36x12xf32>, vector<12x12xf32> -> vector<12x12xf32>
    %87 = arith.addf %82, %86 : vector<12x12xf32>
    %c0_34 = arith.constant 0 : index
    %c0_35 = arith.constant 0 : index
    %88 = vector.load %arg11[%c0_34, %c0_35] : memref<12x12xf32, #tpu.memory_space<vmem>>, vector<12x12xf32>
    %89 = arith.addf %87, %88 : vector<12x12xf32>
    %cst_36 = arith.constant dense<0xFF800000> : vector<12xf32>
    %90 = vector.multi_reduction <maximumf>, %89, %cst_36 [1] : vector<12x12xf32> to vector<12xf32>
    %91 = vector.shape_cast %90 : vector<12xf32> to vector<12x1xf32>
    %92 = vector.broadcast %91 : vector<12x1xf32> to vector<12x12xf32>
    %93 = arith.subf %89, %92 : vector<12x12xf32>
    %94 = math.exp %93 : vector<12x12xf32>
    %cst_37 = arith.constant dense<0.000000e+00> : vector<12xf32>
    %95 = vector.multi_reduction <add>, %94, %cst_37 [1] : vector<12x12xf32> to vector<12xf32>
    %96 = vector.shape_cast %95 : vector<12xf32> to vector<12x1xf32>
    %97 = tpu.reciprocal %96 {approx = true} : vector<12x1xf32> -> vector<12x1xf32>
    %98 = vector.broadcast %97 : vector<12x1xf32> to vector<12x12xf32>
    %99 = arith.mulf %94, %98 : vector<12x12xf32>
    %cst_38 = arith.constant dense<0.000000e+00> : vector<12x6xf32>
    %100 = tpu.matmul %99, %81, %cst_38 {dimension_numbers = #tpu.dot_dimension_numbers<[1], [0], [0], [1], [0, 0, 1, 1], [], []>} : vector<12x12xf32>, vector<12x6xf32>, vector<12x6xf32> -> vector<12x6xf32>
    %c0_39 = arith.constant 0 : index
    %c0_40 = arith.constant 0 : index
    %101 = vector.load %arg8[%c0_39, %c0_40] : memref<6x128xf32, #tpu.memory_space<vmem>>, vector<6x128xf32>
    %cst_41 = arith.constant dense<0.000000e+00> : vector<12x128xf32>
    %102 = tpu.matmul %100, %101, %cst_41 {dimension_numbers = #tpu.dot_dimension_numbers<[1], [0], [0], [1], [0, 0, 1, 1], [], []>} : vector<12x6xf32>, vector<6x128xf32>, vector<12x128xf32> -> vector<12x128xf32>
    %103 = arith.addf %49, %102 : vector<12x128xf32>
    %104 = vector.extract_strided_slice %0 {offsets = [6, 0], sizes = [1, 128], strides = [1, 1]} : vector<16x128xf32> to vector<1x128xf32>
    %105 = vector.broadcast %104 : vector<1x128xf32> to vector<12x128xf32>
    %106 = arith.addf %103, %105 : vector<12x128xf32>
    %cst_42 = arith.constant dense<0.000000e+00> : vector<12xf32>
    %107 = vector.multi_reduction <add>, %106, %cst_42 [1] : vector<12x128xf32> to vector<12xf32>
    %108 = vector.shape_cast %107 : vector<12xf32> to vector<12x1xf32>
    %cst_43 = arith.constant 9.900990e-03 : f32
    %109 = vector.broadcast %cst_43 : f32 to vector<12x1xf32>
    %110 = arith.mulf %108, %109 : vector<12x1xf32>
    %111 = vector.broadcast %110 : vector<12x1xf32> to vector<12x128xf32>
    %112 = arith.subf %106, %111 : vector<12x128xf32>
    %113 = arith.mulf %112, %112 : vector<12x128xf32>
    %cst_44 = arith.constant dense<0.000000e+00> : vector<12xf32>
    %114 = vector.multi_reduction <add>, %113, %cst_44 [1] : vector<12x128xf32> to vector<12xf32>
    %115 = vector.shape_cast %114 : vector<12xf32> to vector<12x1xf32>
    %cst_45 = arith.constant 2.700000e+01 : f32
    %116 = vector.broadcast %cst_45 : f32 to vector<12x1xf32>
    %117 = arith.mulf %116, %110 : vector<12x1xf32>
    %118 = arith.mulf %117, %110 : vector<12x1xf32>
    %119 = arith.subf %115, %118 : vector<12x1xf32>
    %cst_46 = arith.constant 9.900990e-03 : f32
    %120 = vector.broadcast %cst_46 : f32 to vector<12x1xf32>
    %121 = arith.mulf %119, %120 : vector<12x1xf32>
    %cst_47 = arith.constant 9.99999974E-6 : f32
    %122 = vector.broadcast %cst_47 : f32 to vector<12x1xf32>
    %123 = arith.addf %121, %122 : vector<12x1xf32>
    %124 = math.rsqrt %123 : vector<12x1xf32>
    %125 = vector.broadcast %124 : vector<12x1xf32> to vector<12x128xf32>
    %126 = arith.mulf %112, %125 : vector<12x128xf32>
    %127 = vector.extract_strided_slice %0 {offsets = [7, 0], sizes = [1, 128], strides = [1, 1]} : vector<16x128xf32> to vector<1x128xf32>
    %128 = vector.broadcast %127 : vector<1x128xf32> to vector<12x128xf32>
    %129 = arith.mulf %126, %128 : vector<12x128xf32>
    %130 = vector.extract_strided_slice %0 {offsets = [8, 0], sizes = [1, 128], strides = [1, 1]} : vector<16x128xf32> to vector<1x128xf32>
    %131 = vector.broadcast %130 : vector<1x128xf32> to vector<12x128xf32>
    %132 = arith.addf %129, %131 : vector<12x128xf32>
    %c0_48 = arith.constant 0 : index
    %c0_49 = arith.constant 0 : index
    %133 = vector.load %arg5[%c0_48, %c0_49] : memref<128x512xf32, #tpu.memory_space<vmem>>, vector<128x512xf32>
    %cst_50 = arith.constant dense<0.000000e+00> : vector<12x512xf32>
    %134 = tpu.matmul %132, %133, %cst_50 {dimension_numbers = #tpu.dot_dimension_numbers<[1], [0], [0], [1], [0, 0, 1, 1], [], []>} : vector<12x128xf32>, vector<128x512xf32>, vector<12x512xf32> -> vector<12x512xf32>
    %135 = vector.extract_strided_slice %134 {offsets = [0, 0], sizes = [12, 256], strides = [1, 1]} : vector<12x512xf32> to vector<12x256xf32>
    %136 = vector.extract_strided_slice %1 {offsets = [6, 0], sizes = [1, 256], strides = [1, 1]} : vector<8x256xf32> to vector<1x256xf32>
    %137 = vector.broadcast %136 : vector<1x256xf32> to vector<12x256xf32>
    %138 = arith.addf %135, %137 : vector<12x256xf32>
    %139 = vector.extract_strided_slice %134 {offsets = [0, 256], sizes = [12, 256], strides = [1, 1]} : vector<12x512xf32> to vector<12x256xf32>
    %140 = vector.extract_strided_slice %1 {offsets = [7, 0], sizes = [1, 256], strides = [1, 1]} : vector<8x256xf32> to vector<1x256xf32>
    %141 = vector.broadcast %140 : vector<1x256xf32> to vector<12x256xf32>
    %142 = arith.addf %139, %141 : vector<12x256xf32>
    %143 = arith.negf %142 : vector<12x256xf32>
    %144 = math.exp %143 : vector<12x256xf32>
    %cst_51 = arith.constant 1.000000e+00 : f32
    %145 = vector.broadcast %cst_51 : f32 to vector<12x256xf32>
    %146 = arith.addf %145, %144 : vector<12x256xf32>
    %147 = arith.divf %145, %146 : vector<12x256xf32>
    %148 = arith.mulf %138, %147 : vector<12x256xf32>
    %c0_52 = arith.constant 0 : index
    %c0_53 = arith.constant 0 : index
    %c0_54 = arith.constant 0 : index
    %149 = vector.load %arg12[%c0_52, %c0_53, %c0_54] : memref<2x12x12xf32, #tpu.memory_space<vmem>>, vector<1x12x12xf32>
    %150 = vector.shape_cast %149 : vector<1x12x12xf32> to vector<12x12xf32>
    %cst_55 = arith.constant dense<0.000000e+00> : vector<12x256xf32>
    %151 = tpu.matmul %150, %148, %cst_55 {dimension_numbers = #tpu.dot_dimension_numbers<[1], [0], [0], [1], [0, 0, 1, 1], [], []>} : vector<12x12xf32>, vector<12x256xf32>, vector<12x256xf32> -> vector<12x256xf32>
    %c1_56 = arith.constant 1 : index
    %c0_57 = arith.constant 0 : index
    %c0_58 = arith.constant 0 : index
    %152 = vector.load %arg12[%c1_56, %c0_57, %c0_58] : memref<2x12x12xf32, #tpu.memory_space<vmem>>, vector<1x12x12xf32>
    %153 = vector.shape_cast %152 : vector<1x12x12xf32> to vector<12x12xf32>
    %cst_59 = arith.constant dense<0.000000e+00> : vector<12x256xf32>
    %154 = tpu.matmul %153, %148, %cst_59 {dimension_numbers = #tpu.dot_dimension_numbers<[1], [0], [0], [1], [0, 0, 1, 1], [], []>} : vector<12x12xf32>, vector<12x256xf32>, vector<12x256xf32> -> vector<12x256xf32>
    %155 = vector.extract_strided_slice %1 {offsets = [0, 0], sizes = [1, 256], strides = [1, 1]} : vector<8x256xf32> to vector<1x256xf32>
    %156 = vector.broadcast %155 : vector<1x256xf32> to vector<12x256xf32>
    %157 = arith.mulf %151, %156 : vector<12x256xf32>
    %158 = vector.extract_strided_slice %1 {offsets = [1, 0], sizes = [1, 256], strides = [1, 1]} : vector<8x256xf32> to vector<1x256xf32>
    %159 = vector.broadcast %158 : vector<1x256xf32> to vector<12x256xf32>
    %160 = arith.mulf %148, %159 : vector<12x256xf32>
    %161 = arith.addf %157, %160 : vector<12x256xf32>
    %162 = vector.extract_strided_slice %1 {offsets = [2, 0], sizes = [1, 256], strides = [1, 1]} : vector<8x256xf32> to vector<1x256xf32>
    %163 = vector.broadcast %162 : vector<1x256xf32> to vector<12x256xf32>
    %164 = arith.mulf %154, %163 : vector<12x256xf32>
    %165 = arith.addf %161, %164 : vector<12x256xf32>
    %166 = vector.extract_strided_slice %1 {offsets = [3, 0], sizes = [1, 256], strides = [1, 1]} : vector<8x256xf32> to vector<1x256xf32>
    %167 = vector.broadcast %166 : vector<1x256xf32> to vector<12x256xf32>
    %168 = arith.addf %165, %167 : vector<12x256xf32>
    %169 = vector.extract_strided_slice %1 {offsets = [4, 0], sizes = [1, 256], strides = [1, 1]} : vector<8x256xf32> to vector<1x256xf32>
    %170 = vector.broadcast %169 : vector<1x256xf32> to vector<12x256xf32>
    %171 = arith.mulf %168, %170 : vector<12x256xf32>
    %172 = vector.extract_strided_slice %1 {offsets = [5, 0], sizes = [1, 256], strides = [1, 1]} : vector<8x256xf32> to vector<1x256xf32>
    %173 = vector.broadcast %172 : vector<1x256xf32> to vector<12x256xf32>
    %174 = arith.addf %171, %173 : vector<12x256xf32>
    %175 = arith.negf %174 : vector<12x256xf32>
    %176 = math.exp %175 : vector<12x256xf32>
    %cst_60 = arith.constant 1.000000e+00 : f32
    %177 = vector.broadcast %cst_60 : f32 to vector<12x256xf32>
    %178 = arith.addf %177, %176 : vector<12x256xf32>
    %179 = arith.divf %177, %178 : vector<12x256xf32>
    %180 = arith.mulf %174, %179 : vector<12x256xf32>
    %c0_61 = arith.constant 0 : index
    %c0_62 = arith.constant 0 : index
    %181 = vector.load %arg6[%c0_61, %c0_62] : memref<256x128xf32, #tpu.memory_space<vmem>>, vector<256x128xf32>
    %cst_63 = arith.constant dense<0.000000e+00> : vector<12x128xf32>
    %182 = tpu.matmul %180, %181, %cst_63 {dimension_numbers = #tpu.dot_dimension_numbers<[1], [0], [0], [1], [0, 0, 1, 1], [], []>} : vector<12x256xf32>, vector<256x128xf32>, vector<12x128xf32> -> vector<12x128xf32>
    %183 = vector.extract_strided_slice %0 {offsets = [9, 0], sizes = [1, 128], strides = [1, 1]} : vector<16x128xf32> to vector<1x128xf32>
    %184 = vector.broadcast %183 : vector<1x128xf32> to vector<12x128xf32>
    %185 = arith.addf %182, %184 : vector<12x128xf32>
    %186 = arith.addf %106, %185 : vector<12x128xf32>
    %cst_64 = arith.constant dense<0.000000e+00> : vector<12xf32>
    %187 = vector.multi_reduction <add>, %186, %cst_64 [1] : vector<12x128xf32> to vector<12xf32>
    %188 = vector.shape_cast %187 : vector<12xf32> to vector<12x1xf32>
    %cst_65 = arith.constant 9.900990e-03 : f32
    %189 = vector.broadcast %cst_65 : f32 to vector<12x1xf32>
    %190 = arith.mulf %188, %189 : vector<12x1xf32>
    %191 = vector.broadcast %190 : vector<12x1xf32> to vector<12x128xf32>
    %192 = arith.subf %186, %191 : vector<12x128xf32>
    %193 = arith.mulf %192, %192 : vector<12x128xf32>
    %cst_66 = arith.constant dense<0.000000e+00> : vector<12xf32>
    %194 = vector.multi_reduction <add>, %193, %cst_66 [1] : vector<12x128xf32> to vector<12xf32>
    %195 = vector.shape_cast %194 : vector<12xf32> to vector<12x1xf32>
    %cst_67 = arith.constant 2.700000e+01 : f32
    %196 = vector.broadcast %cst_67 : f32 to vector<12x1xf32>
    %197 = arith.mulf %196, %190 : vector<12x1xf32>
    %198 = arith.mulf %197, %190 : vector<12x1xf32>
    %199 = arith.subf %195, %198 : vector<12x1xf32>
    %cst_68 = arith.constant 9.900990e-03 : f32
    %200 = vector.broadcast %cst_68 : f32 to vector<12x1xf32>
    %201 = arith.mulf %199, %200 : vector<12x1xf32>
    %cst_69 = arith.constant 9.99999974E-6 : f32
    %202 = vector.broadcast %cst_69 : f32 to vector<12x1xf32>
    %203 = arith.addf %201, %202 : vector<12x1xf32>
    %204 = math.rsqrt %203 : vector<12x1xf32>
    %205 = vector.broadcast %204 : vector<12x1xf32> to vector<12x128xf32>
    %206 = arith.mulf %192, %205 : vector<12x128xf32>
    %207 = vector.extract_strided_slice %0 {offsets = [10, 0], sizes = [1, 128], strides = [1, 1]} : vector<16x128xf32> to vector<1x128xf32>
    %208 = vector.broadcast %207 : vector<1x128xf32> to vector<12x128xf32>
    %209 = arith.mulf %206, %208 : vector<12x128xf32>
    %210 = vector.extract_strided_slice %0 {offsets = [11, 0], sizes = [1, 128], strides = [1, 1]} : vector<16x128xf32> to vector<1x128xf32>
    %211 = vector.broadcast %210 : vector<1x128xf32> to vector<12x128xf32>
    %212 = arith.addf %209, %211 : vector<12x128xf32>
    %c2 = arith.constant 2 : index
    %c0_70 = arith.constant 0 : index
    %c0_71 = arith.constant 0 : index
    %213 = vector.load %arg4[%c2, %c0_70, %c0_71] : memref<4x128x128xf32, #tpu.memory_space<vmem>>, vector<1x128x128xf32>
    %214 = vector.shape_cast %213 : vector<1x128x128xf32> to vector<128x128xf32>
    %cst_72 = arith.constant dense<0.000000e+00> : vector<12x128xf32>
    %215 = tpu.matmul %212, %214, %cst_72 {dimension_numbers = #tpu.dot_dimension_numbers<[1], [0], [0], [1], [0, 0, 1, 1], [], []>} : vector<12x128xf32>, vector<128x128xf32>, vector<12x128xf32> -> vector<12x128xf32>
    %216 = vector.extract_strided_slice %0 {offsets = [12, 0], sizes = [1, 128], strides = [1, 1]} : vector<16x128xf32> to vector<1x128xf32>
    %217 = vector.broadcast %216 : vector<1x128xf32> to vector<12x128xf32>
    %218 = arith.addf %215, %217 : vector<12x128xf32>
    %219 = arith.negf %218 : vector<12x128xf32>
    %220 = math.exp %219 : vector<12x128xf32>
    %cst_73 = arith.constant 1.000000e+00 : f32
    %221 = vector.broadcast %cst_73 : f32 to vector<12x128xf32>
    %222 = arith.addf %221, %220 : vector<12x128xf32>
    %223 = arith.divf %221, %222 : vector<12x128xf32>
    %224 = arith.mulf %218, %223 : vector<12x128xf32>
    %c3 = arith.constant 3 : index
    %c0_74 = arith.constant 0 : index
    %c0_75 = arith.constant 0 : index
    %225 = vector.load %arg4[%c3, %c0_74, %c0_75] : memref<4x128x128xf32, #tpu.memory_space<vmem>>, vector<1x128x128xf32>
    %226 = vector.shape_cast %225 : vector<1x128x128xf32> to vector<128x128xf32>
    %cst_76 = arith.constant dense<0.000000e+00> : vector<12x128xf32>
    %227 = tpu.matmul %224, %226, %cst_76 {dimension_numbers = #tpu.dot_dimension_numbers<[1], [0], [0], [1], [0, 0, 1, 1], [], []>} : vector<12x128xf32>, vector<128x128xf32>, vector<12x128xf32> -> vector<12x128xf32>
    %228 = vector.extract_strided_slice %0 {offsets = [13, 0], sizes = [1, 128], strides = [1, 1]} : vector<16x128xf32> to vector<1x128xf32>
    %229 = vector.broadcast %228 : vector<1x128xf32> to vector<12x128xf32>
    %230 = arith.addf %227, %229 : vector<12x128xf32>
    %cst_77 = arith.constant 5.000000e-01 : f32
    %231 = vector.broadcast %cst_77 : f32 to vector<12x128xf32>
    %232 = arith.mulf %231, %230 : vector<12x128xf32>
    %233 = arith.addf %186, %232 : vector<12x128xf32>
    %cst_78 = arith.constant dense<0.000000e+00> : vector<12xf32>
    %234 = vector.multi_reduction <add>, %233, %cst_78 [1] : vector<12x128xf32> to vector<12xf32>
    %235 = vector.shape_cast %234 : vector<12xf32> to vector<12x1xf32>
    %cst_79 = arith.constant 9.900990e-03 : f32
    %236 = vector.broadcast %cst_79 : f32 to vector<12x1xf32>
    %237 = arith.mulf %235, %236 : vector<12x1xf32>
    %238 = vector.broadcast %237 : vector<12x1xf32> to vector<12x128xf32>
    %239 = arith.subf %233, %238 : vector<12x128xf32>
    %240 = arith.mulf %239, %239 : vector<12x128xf32>
    %cst_80 = arith.constant dense<0.000000e+00> : vector<12xf32>
    %241 = vector.multi_reduction <add>, %240, %cst_80 [1] : vector<12x128xf32> to vector<12xf32>
    %242 = vector.shape_cast %241 : vector<12xf32> to vector<12x1xf32>
    %cst_81 = arith.constant 2.700000e+01 : f32
    %243 = vector.broadcast %cst_81 : f32 to vector<12x1xf32>
    %244 = arith.mulf %243, %237 : vector<12x1xf32>
    %245 = arith.mulf %244, %237 : vector<12x1xf32>
    %246 = arith.subf %242, %245 : vector<12x1xf32>
    %cst_82 = arith.constant 9.900990e-03 : f32
    %247 = vector.broadcast %cst_82 : f32 to vector<12x1xf32>
    %248 = arith.mulf %246, %247 : vector<12x1xf32>
    %cst_83 = arith.constant 9.99999974E-6 : f32
    %249 = vector.broadcast %cst_83 : f32 to vector<12x1xf32>
    %250 = arith.addf %248, %249 : vector<12x1xf32>
    %251 = math.rsqrt %250 : vector<12x1xf32>
    %252 = vector.broadcast %251 : vector<12x1xf32> to vector<12x128xf32>
    %253 = arith.mulf %239, %252 : vector<12x128xf32>
    %254 = vector.extract_strided_slice %0 {offsets = [14, 0], sizes = [1, 128], strides = [1, 1]} : vector<16x128xf32> to vector<1x128xf32>
    %255 = vector.broadcast %254 : vector<1x128xf32> to vector<12x128xf32>
    %256 = arith.mulf %253, %255 : vector<12x128xf32>
    %257 = vector.extract_strided_slice %0 {offsets = [15, 0], sizes = [1, 128], strides = [1, 1]} : vector<16x128xf32> to vector<1x128xf32>
    %258 = vector.broadcast %257 : vector<1x128xf32> to vector<12x128xf32>
    %259 = arith.addf %256, %258 : vector<12x128xf32>
    %c0_84 = arith.constant 0 : index
    %c0_85 = arith.constant 0 : index
    %c0_86 = arith.constant 0 : index
    %260 = vector.load %arg13[%c0_84, %c0_85, %c0_86] : memref<2x12x128xf32, #tpu.memory_space<vmem>>, vector<1x12x128xf32>
    %261 = vector.shape_cast %260 : vector<1x12x128xf32> to vector<12x128xf32>
    %262 = arith.mulf %259, %261 : vector<12x128xf32>
    %c1_87 = arith.constant 1 : index
    %c0_88 = arith.constant 0 : index
    %c0_89 = arith.constant 0 : index
    %263 = vector.load %arg13[%c1_87, %c0_88, %c0_89] : memref<2x12x128xf32, #tpu.memory_space<vmem>>, vector<1x12x128xf32>
    %264 = vector.shape_cast %263 : vector<1x12x128xf32> to vector<12x128xf32>
    %265 = arith.addf %262, %264 : vector<12x128xf32>
    %cst_90 = arith.constant 0.000000e+00 : f32
    %266 = vector.broadcast %cst_90 : f32 to vector<12x128xf32>
    %267 = arith.cmpf ogt, %265, %266 : vector<12x128xf32>
    %cst_91 = arith.constant 2.000000e-01 : f32
    %268 = vector.broadcast %cst_91 : f32 to vector<12x128xf32>
    %269 = arith.mulf %268, %265 : vector<12x128xf32>
    %270 = arith.select %267, %265, %269 : vector<12x128xi1>, vector<12x128xf32>
    %271 = vector.extract_strided_slice %270 {offsets = [0, 0], sizes = [2, 128], strides = [1, 1]} : vector<12x128xf32> to vector<2x128xf32>
    %c0_92 = arith.constant 0 : index
    %c0_93 = arith.constant 0 : index
    %c0_94 = arith.constant 0 : index
    %272 = vector.load %arg14[%c0_92, %c0_93, %c0_94] : memref<6x128x128xf32, #tpu.memory_space<vmem>>, vector<1x128x128xf32>
    %273 = vector.shape_cast %272 : vector<1x128x128xf32> to vector<128x128xf32>
    %cst_95 = arith.constant dense<0.000000e+00> : vector<2x128xf32>
    %274 = tpu.matmul %271, %273, %cst_95 {dimension_numbers = #tpu.dot_dimension_numbers<[1], [0], [0], [1], [0, 0, 1, 1], [], []>} : vector<2x128xf32>, vector<128x128xf32>, vector<2x128xf32> -> vector<2x128xf32>
    %275 = vector.extract_strided_slice %270 {offsets = [2, 0], sizes = [2, 128], strides = [1, 1]} : vector<12x128xf32> to vector<2x128xf32>
    %c1_96 = arith.constant 1 : index
    %c0_97 = arith.constant 0 : index
    %c0_98 = arith.constant 0 : index
    %276 = vector.load %arg14[%c1_96, %c0_97, %c0_98] : memref<6x128x128xf32, #tpu.memory_space<vmem>>, vector<1x128x128xf32>
    %277 = vector.shape_cast %276 : vector<1x128x128xf32> to vector<128x128xf32>
    %cst_99 = arith.constant dense<0.000000e+00> : vector<2x128xf32>
    %278 = tpu.matmul %275, %277, %cst_99 {dimension_numbers = #tpu.dot_dimension_numbers<[1], [0], [0], [1], [0, 0, 1, 1], [], []>} : vector<2x128xf32>, vector<128x128xf32>, vector<2x128xf32> -> vector<2x128xf32>
    %279 = arith.addf %274, %278 : vector<2x128xf32>
    %280 = vector.extract_strided_slice %270 {offsets = [4, 0], sizes = [2, 128], strides = [1, 1]} : vector<12x128xf32> to vector<2x128xf32>
    %c2_100 = arith.constant 2 : index
    %c0_101 = arith.constant 0 : index
    %c0_102 = arith.constant 0 : index
    %281 = vector.load %arg14[%c2_100, %c0_101, %c0_102] : memref<6x128x128xf32, #tpu.memory_space<vmem>>, vector<1x128x128xf32>
    %282 = vector.shape_cast %281 : vector<1x128x128xf32> to vector<128x128xf32>
    %cst_103 = arith.constant dense<0.000000e+00> : vector<2x128xf32>
    %283 = tpu.matmul %280, %282, %cst_103 {dimension_numbers = #tpu.dot_dimension_numbers<[1], [0], [0], [1], [0, 0, 1, 1], [], []>} : vector<2x128xf32>, vector<128x128xf32>, vector<2x128xf32> -> vector<2x128xf32>
    %284 = arith.addf %279, %283 : vector<2x128xf32>
    %285 = vector.extract_strided_slice %270 {offsets = [6, 0], sizes = [2, 128], strides = [1, 1]} : vector<12x128xf32> to vector<2x128xf32>
    %c3_104 = arith.constant 3 : index
    %c0_105 = arith.constant 0 : index
    %c0_106 = arith.constant 0 : index
    %286 = vector.load %arg14[%c3_104, %c0_105, %c0_106] : memref<6x128x128xf32, #tpu.memory_space<vmem>>, vector<1x128x128xf32>
    %287 = vector.shape_cast %286 : vector<1x128x128xf32> to vector<128x128xf32>
    %cst_107 = arith.constant dense<0.000000e+00> : vector<2x128xf32>
    %288 = tpu.matmul %285, %287, %cst_107 {dimension_numbers = #tpu.dot_dimension_numbers<[1], [0], [0], [1], [0, 0, 1, 1], [], []>} : vector<2x128xf32>, vector<128x128xf32>, vector<2x128xf32> -> vector<2x128xf32>
    %289 = arith.addf %284, %288 : vector<2x128xf32>
    %290 = vector.extract_strided_slice %270 {offsets = [8, 0], sizes = [2, 128], strides = [1, 1]} : vector<12x128xf32> to vector<2x128xf32>
    %c4 = arith.constant 4 : index
    %c0_108 = arith.constant 0 : index
    %c0_109 = arith.constant 0 : index
    %291 = vector.load %arg14[%c4, %c0_108, %c0_109] : memref<6x128x128xf32, #tpu.memory_space<vmem>>, vector<1x128x128xf32>
    %292 = vector.shape_cast %291 : vector<1x128x128xf32> to vector<128x128xf32>
    %cst_110 = arith.constant dense<0.000000e+00> : vector<2x128xf32>
    %293 = tpu.matmul %290, %292, %cst_110 {dimension_numbers = #tpu.dot_dimension_numbers<[1], [0], [0], [1], [0, 0, 1, 1], [], []>} : vector<2x128xf32>, vector<128x128xf32>, vector<2x128xf32> -> vector<2x128xf32>
    %294 = arith.addf %289, %293 : vector<2x128xf32>
    %295 = vector.extract_strided_slice %270 {offsets = [10, 0], sizes = [2, 128], strides = [1, 1]} : vector<12x128xf32> to vector<2x128xf32>
    %c5 = arith.constant 5 : index
    %c0_111 = arith.constant 0 : index
    %c0_112 = arith.constant 0 : index
    %296 = vector.load %arg14[%c5, %c0_111, %c0_112] : memref<6x128x128xf32, #tpu.memory_space<vmem>>, vector<1x128x128xf32>
    %297 = vector.shape_cast %296 : vector<1x128x128xf32> to vector<128x128xf32>
    %cst_113 = arith.constant dense<0.000000e+00> : vector<2x128xf32>
    %298 = tpu.matmul %295, %297, %cst_113 {dimension_numbers = #tpu.dot_dimension_numbers<[1], [0], [0], [1], [0, 0, 1, 1], [], []>} : vector<2x128xf32>, vector<128x128xf32>, vector<2x128xf32> -> vector<2x128xf32>
    %299 = arith.addf %294, %298 : vector<2x128xf32>
    %c0_114 = arith.constant 0 : index
    %c0_115 = arith.constant 0 : index
    %300 = vector.load %arg15[%c0_114, %c0_115] : memref<1x128xf32, #tpu.memory_space<vmem>>, vector<1x128xf32>
    %301 = vector.broadcast %300 : vector<1x128xf32> to vector<2x128xf32>
    %302 = arith.addf %299, %301 : vector<2x128xf32>
    %cst_116 = arith.constant dense<0xFF800000> : vector<2xf32>
    %303 = vector.multi_reduction <maximumf>, %302, %cst_116 [1] : vector<2x128xf32> to vector<2xf32>
    %304 = vector.shape_cast %303 : vector<2xf32> to vector<2x1xf32>
    %305 = vector.broadcast %304 : vector<2x1xf32> to vector<2x128xf32>
    %306 = arith.subf %302, %305 : vector<2x128xf32>
    %307 = math.exp %306 : vector<2x128xf32>
    %cst_117 = arith.constant dense<0.000000e+00> : vector<2xf32>
    %308 = vector.multi_reduction <add>, %307, %cst_117 [1] : vector<2x128xf32> to vector<2xf32>
    %309 = vector.shape_cast %308 : vector<2xf32> to vector<2x1xf32>
    %310 = vector.broadcast %309 : vector<2x1xf32> to vector<2x128xf32>
    %311 = arith.divf %307, %310 : vector<2x128xf32>
    %c0_118 = arith.constant 0 : index
    %c0_119 = arith.constant 0 : index
    %312 = vector.load %arg16[%c0_118, %c0_119] : memref<2x128xf32, #tpu.memory_space<vmem>>, vector<2x128xf32>
    tpu.vector_store %arg16[%c0_118, %c0_119], %311 {strides = array<i32>} : memref<2x128xf32, #tpu.memory_space<vmem>>, vector<2x128xf32>,
    return
  }
  func.func @transform_0(%arg0: i32) -> (i32, i32) {
    %c0_i32 = arith.constant 0 : i32
    %c0_i32_0 = arith.constant 0 : i32
    %c0_i32_1 = arith.constant 0 : i32
    return %c0_i32, %c0_i32_0 : i32, i32
  }
  func.func @transform_1(%arg0: i32) -> (i32, i32) {
    %c0_i32 = arith.constant 0 : i32
    %c0_i32_0 = arith.constant 0 : i32
    %c0_i32_1 = arith.constant 0 : i32
    return %c0_i32, %c0_i32_0 : i32, i32
  }
  func.func @transform_2(%arg0: i32) -> (i32, i32) {
    %c0_i32 = arith.constant 0 : i32
    %c0_i32_0 = arith.constant 0 : i32
    %c0_i32_1 = arith.constant 0 : i32
    return %c0_i32, %c0_i32_0 : i32, i32
  }
  func.func @transform_3(%arg0: i32) -> (i32, i32, i32) {
    %c0_i32 = arith.constant 0 : i32
    %c0_i32_0 = arith.constant 0 : i32
    %c0_i32_1 = arith.constant 0 : i32
    %c0_i32_2 = arith.constant 0 : i32
    return %c0_i32, %c0_i32_0, %c0_i32_1 : i32, i32, i32
  }
  func.func @transform_4(%arg0: i32) -> (i32, i32) {
    %c0_i32 = arith.constant 0 : i32
    %c0_i32_0 = arith.constant 0 : i32
    %c0_i32_1 = arith.constant 0 : i32
    return %c0_i32, %c0_i32_0 : i32, i32
  }
  func.func @transform_5(%arg0: i32) -> (i32, i32) {
    %c0_i32 = arith.constant 0 : i32
    %c0_i32_0 = arith.constant 0 : i32
    %c0_i32_1 = arith.constant 0 : i32
    return %c0_i32, %c0_i32_0 : i32, i32
  }
  func.func @transform_6(%arg0: i32) -> (i32, i32) {
    %c0_i32 = arith.constant 0 : i32
    %c0_i32_0 = arith.constant 0 : i32
    %c0_i32_1 = arith.constant 0 : i32
    return %c0_i32, %c0_i32_0 : i32, i32
  }
  func.func @transform_7(%arg0: i32) -> (i32, i32) {
    %c0_i32 = arith.constant 0 : i32
    %c0_i32_0 = arith.constant 0 : i32
    %c0_i32_1 = arith.constant 0 : i32
    return %c0_i32, %c0_i32_0 : i32, i32
  }
  func.func @transform_8(%arg0: i32) -> (i32, i32) {
    %c0_i32 = arith.constant 0 : i32
    %c0_i32_0 = arith.constant 0 : i32
    %c0_i32_1 = arith.constant 0 : i32
    return %c0_i32, %c0_i32_0 : i32, i32
  }
  func.func @transform_9(%arg0: i32) -> (i32, i32) {
    %c0_i32 = arith.constant 0 : i32
    %c0_i32_0 = arith.constant 0 : i32
    %c0_i32_1 = arith.constant 0 : i32
    return %c0_i32, %c0_i32_0 : i32, i32
  }
  func.func @transform_10(%arg0: i32) -> (i32, i32) {
    %c0_i32 = arith.constant 0 : i32
    %c0_i32_0 = arith.constant 0 : i32
    %c0_i32_1 = arith.constant 0 : i32
    return %c0_i32, %c0_i32_0 : i32, i32
  }
  func.func @transform_11(%arg0: i32) -> (i32, i32, i32) {
    %c0_i32 = arith.constant 0 : i32
    %c0_i32_0 = arith.constant 0 : i32
    %c0_i32_1 = arith.constant 0 : i32
    %c0_i32_2 = arith.constant 0 : i32
    return %c0_i32, %c0_i32_0, %c0_i32_1 : i32, i32, i32
  }
  func.func @transform_12(%arg0: i32) -> (i32, i32, i32) {
    %c0_i32 = arith.constant 0 : i32
    %c0_i32_0 = arith.constant 0 : i32
    %c0_i32_1 = arith.constant 0 : i32
    %c0_i32_2 = arith.constant 0 : i32
    return %c0_i32, %c0_i32_0, %c0_i32_1 : i32, i32, i32
  }
  func.func @transform_13(%arg0: i32) -> (i32, i32, i32) {
    %c0_i32 = arith.constant 0 : i32
    %c0_i32_0 = arith.constant 0 : i32
    %c0_i32_1 = arith.constant 0 : i32
    %c0_i32_2 = arith.constant 0 : i32
    return %c0_i32, %c0_i32_0, %c0_i32_1 : i32, i32, i32
  }
  func.func @transform_14(%arg0: i32) -> (i32, i32) {
    %c0_i32 = arith.constant 0 : i32
    %c0_i32_0 = arith.constant 0 : i32
    %c0_i32_1 = arith.constant 0 : i32
    return %c0_i32, %c0_i32_0 : i32, i32
  }
  func.func @transform_15(%arg0: i32) -> (i32, i32) {
    %c0_i32 = arith.constant 0 : i32
    %c0_i32_0 = arith.constant 0 : i32
    %c0_i32_1 = arith.constant 0 : i32
    return %c0_i32, %c0_i32_0 : i32, i32
  }
}

</mosaic_0001>

<bundles_post_ra>
// kernel: reverse.0
= control target key start
LH: loop header
LB: loop body
LE: loop exit
PB: predicated region body
PF: predicated region fallthrough
CT: control target
= control target key end

     0   :  { %v2_v0 = vlaneseq  ;;  %s117_s0 = inlined_call_operand.vmem [shape: f32[2,6,63], index: 0, kind: input, shape index: {}]   ;;  %s118_s1 = inlined_call_operand.vmem [shape: f32[2,6,63], index: 1, kind: output, shape index: {}]  }
   0x1   :  { %v34_v2 = vld [vmem:[%s117_s0] sm:$0xff]  ;;  %v36_v3 = vld [vmem:[%s117_s0 + $0x8] sm:$0xff] }
   0x2   :  { %v3_v1 = vsub.s32 62, %v2_v0 }
   0x4   :  { %4 = vset.pattern.permute.xlu0 %v3_v1 }
   0x5   :  { %42 = vperm.xlu0 %4, %v34_v2  }
   0x9   :  { %48 = vperm.xlu0 %4, %v36_v3  }
  0x84   :  { %v43_v4 = vpop.permute.xlu0 %42 }
  0x85   :  { %81 = vst [vmem:[%s118_s1] sm:$0xff] %v43_v4 }
  0x88   :  { %v49_v5 = vpop.permute.xlu0 %48 }
  0x89   :  { %83 = vst [vmem:[%s118_s1 + $0x8] sm:$0xff] %v49_v5 }

// kernel: net_forward.1
= control target key start
LH: loop header
LB: loop body
LE: loop exit
PB: predicated region body
PF: predicated region fallthrough
CT: control target
= control target key end

     0   :  { %20 = vsyncpa [#allocation3], 0  ;;  %s5337_s0 = inlined_call_operand.vmem [shape: f32[12,128], index: 0, kind: input, shape index: {}]   ;;  %s5338_s1 = inlined_call_operand.hbm [shape: f32[16,128], index: 1, kind: input, shape index: {}]   ;;  %s5339_s2 = inlined_call_operand.hbm [shape: f32[8,256], index: 2, kind: input, shape index: {}]   ;;  %s5340_s3 = inlined_call_operand.vmem [shape: f32[4,128,128], index: 3, kind: input, shape index: {}]   ;;  %s5341_s4 = inlined_call_operand.vmem [shape: f32[128,512], index: 4, kind: input, shape index: {}]   ;;  %s5342_s5 = inlined_call_operand.vmem [shape: f32[256,128], index: 5, kind: input, shape index: {}]   ;;  %s5343_s6 = inlined_call_operand.vmem [shape: f32[128,48], index: 6, kind: input, shape index: {}]   ;;  %s5344_s7 = inlined_call_operand.hbm [shape: f32[6,128], index: 7, kind: input, shape index: {}]   ;;  %s5345_s8 = inlined_call_operand.vmem [shape: f32[12,36], index: 8, kind: input, shape index: {}]   ;;  %s5346_s9 = inlined_call_operand.vmem [shape: f32[36,12], index: 9, kind: input, shape index: {}]   ;;  %s5347_s10 = inlined_call_operand.hbm [shape: f32[12,12], index: 10, kind: input, shape index: {}]   ;;  %s5348_s11 = inlined_call_operand.vmem [shape: f32[2,12,12], index: 11, kind: input, shape index: {}]   ;;  %s5349_s12 = inlined_call_operand.vmem [shape: f32[2,12,128], index: 12, kind: input, shape index: {}]   ;;  %s5350_s13 = inlined_call_operand.vmem [shape: f32[6,128,128], index: 13, kind: input, shape index: {}]   ;;  %s5351_s14 = inlined_call_operand.vmem [shape: f32[1,128], index: 14, kind: input, shape index: {}]   ;;  %s5352_s15 = inlined_call_operand.hbm [shape: f32[2,128], index: 15, kind: output, shape index: {}]  }
   0x1   :  { %21 = vsyncpa [#allocation6], 0 }
   0x2   :  { %22 = vsyncpa [#allocation9], 0 }
   0x3   :  { %23 = vsyncpa [#allocation4], 0  ;;  %s3965_s18 = smov [#allocation5]   ;;  %s3966_s20 = smov [#allocation2]  }
   0x4   :  { %s44_s19 = sshll.u32 %s3965_s18, 4  ;;  %s31_s21 = sshll.u32 %s3966_s20, 4  ;;  %s45_s19 = int_to_ptr.vmem [resolvable:$true] %s44_s19  ;;  %s4058_s21 = int_to_ptr.vmem [resolvable:$true] %s31_s21 }
   0x5   :  { %s3847_s24 = scalar_lea.hbm %s5339_s2, 256 }
   0x6   :  { %p3848_p0 = scmp.ne.s32.totalorder %s5339_s2, %s3847_s24  ;;  %p3851_p1 = scmp.lt.u32.totalorder %s3847_s24, %s5339_s2 }
   0x8   :  { %p3853_p2 = pnand %p3851_p1, %p3848_p0 }
   0xa   :  { %3856 = shalt.err (!%p3853_p2)
}
   0xb   :  { %s3857_s29 = scalar_lea.vmem %s45_s19, 256  ;;  %p3862_p4 = scmp.lt.s32.totalorder %s45_s19, %s45_s19 }
   0xc   :  { %p3858_p3 = scmp.ne.s32.totalorder %s45_s19, %s3857_s29  ;;  %p3863_p5 = scmp.lt.s32.totalorder %s3857_s29, %s3857_s29 }
   0xe   :  { %p3864_p6 = por %p3863_p5, %p3862_p4 }
  0x10   :  { %p3865_p7 = pnand %p3864_p6, %p3858_p3 }
  0x12   :  { %3868 = shalt.err (!%p3865_p7)
}
  0x13   :  { %47 = dma.hbm_to_vmem [thread:$0]  %s5339_s2, 256, %s45_s19, [#allocation6]  }
  0x14   :  { %s3869_s20 = scalar_lea.hbm %s5338_s1, 256 }
  0x15   :  { %p3870_p8 = scmp.ne.s32.totalorder %s5338_s1, %s3869_s20  ;;  %p3873_p9 = scmp.lt.u32.totalorder %s3869_s20, %s5338_s1 }
  0x17   :  { %p3875_p10 = pnand %p3873_p9, %p3870_p8 }
  0x19   :  { %3878 = shalt.err (!%p3875_p10)
}
  0x1a   :  { %s3879_s26 = scalar_lea.vmem %s4058_s21, 256  ;;  %p3884_p12 = scmp.lt.s32.totalorder %s4058_s21, %s4058_s21 }
  0x1b   :  { %p3880_p11 = scmp.ne.s32.totalorder %s4058_s21, %s3879_s26  ;;  %p3885_p13 = scmp.lt.s32.totalorder %s3879_s26, %s3879_s26 }
  0x1d   :  { %p3886_p0 = por %p3885_p13, %p3884_p12 }
  0x1f   :  { %p3887_p1 = pnand %p3886_p0, %p3880_p11 }
  0x21   :  { %3890 = shalt.err (!%p3887_p1)
}
  0x22   :  { %s3967_s2 = smov 128   ;;  %s3968_s19 = smov 8  }
  0x23   :  { %37 = dma.hbm_to_vmem [thread:$0]  %s5338_s1, 256, %s4058_s21, [#allocation3], %s3967_s2, %s3967_s2, %s3968_s19  }
  0x24   :  { %s3969_s29 = smov [#allocation7]   ;;  %s3970_s16 = smov [#allocation8]  }
  0x25   :  { %s62_s30 = sshll.u32 %s3969_s29, 4  ;;  %s75_s17 = sshll.u32 %s3970_s16, 4  ;;  %s63_s30 = int_to_ptr.vmem [resolvable:$true] %s62_s30  ;;  %s4092_s17 = int_to_ptr.vmem [resolvable:$true] %s75_s17 }
  0x26   :  { %s3891_s22 = scalar_lea.hbm %s5344_s7, 128 }
  0x27   :  { %p3892_p2 = scmp.ne.s32.totalorder %s5344_s7, %s3891_s22  ;;  %p3895_p3 = scmp.lt.u32.totalorder %s3891_s22, %s5344_s7 }
  0x29   :  { %p3897_p4 = pnand %p3895_p3, %p3892_p2 }
  0x2b   :  { %3900 = shalt.err (!%p3897_p4)
}
  0x2c   :  { %s3901_s1 = scalar_lea.vmem %s63_s30, 128  ;;  %p3906_p6 = scmp.lt.s32.totalorder %s63_s30, %s63_s30 }
  0x2d   :  { %p3902_p5 = scmp.ne.s32.totalorder %s63_s30, %s3901_s1  ;;  %p3907_p7 = scmp.lt.s32.totalorder %s3901_s1, %s3901_s1 }
  0x2f   :  { %p3908_p8 = por %p3907_p7, %p3906_p6 }
  0x31   :  { %p3909_p9 = pnand %p3908_p8, %p3902_p5 }
  0x33   :  { %3912 = shalt.err (!%p3909_p9)
}
  0x34   :  { %65 = dma.hbm_to_vmem [thread:$0]  %s5344_s7, 128, %s63_s30, [#allocation6]  }
  0x35   :  { %s3913_s16 = scalar_lea.hbm %s5347_s10, 256 }
  0x36   :  { %p3914_p10 = scmp.ne.s32.totalorder %s5347_s10, %s3913_s16  ;;  %p3917_p11 = scmp.lt.u32.totalorder %s3913_s16, %s5347_s10 }
  0x38   :  { %p3919_p12 = pnand %p3917_p11, %p3914_p10 }
  0x3a   :  { %3922 = shalt.err (!%p3919_p12)
}
  0x3b   :  { %s3923_s24 = scalar_lea.vmem %s4092_s17, 256  ;;  %p3928_p0 = scmp.lt.s32.totalorder %s4092_s17, %s4092_s17 }
  0x3c   :  { %p3924_p13 = scmp.ne.s32.totalorder %s4092_s17, %s3923_s24  ;;  %p3929_p1 = scmp.lt.s32.totalorder %s3923_s24, %s3923_s24 }
  0x3e   :  { %p3930_p2 = por %p3929_p1, %p3928_p0 }
  0x40   :  { %p3931_p3 = pnand %p3930_p2, %p3924_p13 }
  0x42   :  { %3934 = shalt.err (!%p3931_p3)
}
  0x43   :  { %81 = dma.hbm_to_vmem [thread:$0]  %s5347_s10, 256, %s4092_s17, [#allocation9], %s3967_s2, %s3967_s2, %s3968_s19  }
  0x44   :  { %3957 = dma.done.wait [#allocation3], 256  }
  0x45   :  { %3958 = vsyncadd [#allocation3], 4294967040 }
  0x46   :  { %3959 = dma.done.wait [#allocation6], 384  }
  0x47   :  { %3960 = vsyncadd [#allocation6], 4294966912 }
  0x48   :  { %3961 = dma.done.wait [#allocation9], 256  }
  0x49   :  { %3962 = vsyncadd [#allocation9], 4294967040  ;;  %vm110_vm0 = vcmask 1043456   ;;  %v4129_v0 = vld [vmem:[%s5337_s0] sm:$0xff]  ;;  %v4134_v1 = vld [vmem:[%s5337_s0 + $0x8] sm:$0xf]  ;;  %v139_v43 = vlaneseq }
  0x4a   :  { %108 = vadd.xlane.f32.xlu0 %v4129_v0  ;;  %v111_v2 = vsel %vm110_vm0, %v4134_v1, 0.0  ;;  %v151_v3 = vld [vmem:[%s5340_s3] sm:$0xff]  ;;  %v152_v4 = vld [vmem:[%s5340_s3 + $0x8] sm:$0xff]  ;;  %v153_v15 = vld [vmem:[%s5340_s3 + $0x10] sm:$0xff]  ;;  %vm593_vm1 = vcmask 48128   ;;  %vm502_vm2 = vcmask 293888  }
  0x4b   :  { %v3310_v5 = vpack.c.bf16 %v152_v4, %v151_v3  ;;  %v154_v16 = vld [vmem:[%s5340_s3 + $0x18] sm:$0xff]  ;;  %v155_v18 = vld [vmem:[%s5340_s3 + $0x20] sm:$0xff]  ;;  %v156_v19 = vld [vmem:[%s5340_s3 + $0x28] sm:$0xff]  ;;  %v4198_v48 = vshrl.u32 %v139_v43, 7  ;;  %vm681_vm4 = vcmask 97280   ;;  %vm685_vm5 = vcmask 93184  }
  0x4c   :  { %v3314_v17 = vpack.c.bf16 %v154_v16, %v153_v15  ;;  %v3318_v20 = vpack.c.bf16 %v156_v19, %v155_v18  ;;  %v157_v21 = vld [vmem:[%s5340_s3 + $0x30] sm:$0xff]  ;;  %v158_v22 = vld [vmem:[%s5340_s3 + $0x38] sm:$0xff]  ;;  %v159_v24 = vld [vmem:[%s5340_s3 + $0x40] sm:$0xff]  ;;  %vm3973_vm6 = vmmov 1   ;;  %vm800_vm8 = vcmask 1045504   ;;  %s3977_s30 = smov [#allocation10]  }
  0x4d   :  { %3311 = vmatprep.subr.bf16.mxu0 %v3310_v5  ;;  %v3322_v23 = vpack.c.bf16 %v158_v22, %v157_v21  ;;  %v160_v25 = vld [vmem:[%s5340_s3 + $0x48] sm:$0xff]  ;;  %v161_v27 = vld [vmem:[%s5340_s3 + $0x50] sm:$0xff]  ;;  %v162_v28 = vld [vmem:[%s5340_s3 + $0x58] sm:$0xff]  ;;  %v4201_v50 = vsub.s32 0, %v4198_v48  ;;  %v4206_v52 = vsub.s32 1, %v4198_v48  ;;  %vm3976_vm9 = vmmov 0  }
  0x4e   :  { %112 = vadd.xlane.f32.xlu0 %v111_v2  ;;  %3313 = vmatpush3.bf16.msra.mxu0 %v3310_v5  ;;  %v3326_v26 = vpack.c.bf16 %v160_v25, %v159_v24  ;;  %v163_v29 = vld [vmem:[%s5340_s3 + $0x60] sm:$0xff]  ;;  %v3330_v30 = vpack.c.bf16 %v162_v28, %v161_v27  ;;  %v164_v31 = vld [vmem:[%s5340_s3 + $0x68] sm:$0xff]  ;;  %v165_v33 = vld [vmem:[%s5340_s3 + $0x70] sm:$0xff]  ;;  %v4263_v25 = vsub.s32 2, %v4198_v48  ;;  %vm2449_vm12 = vcmask 1041408   ;;  %s2468_s25 = sshll.u32 %s3977_s30, 4  ;;  %s2469_s25 = int_to_ptr.vmem [resolvable:$true] %s2468_s25 }
  0x4f   :  { %3315 = vmatprep.subr.bf16.mxu0 %v3314_v17  ;;  %v3334_v32 = vpack.c.bf16 %v164_v31, %v163_v29  ;;  %v166_v34 = vld [vmem:[%s5340_s3 + $0x78] sm:$0xff]  ;;  %v4203_v51 = vld [vmem:[#allocation2] sm:$0xff]  ;;  %v2482_v2 = vld [vmem:[%s5340_s3 + $0x88] sm:$0xff]  ;;  %p3940_p5 = scmp.lt.s32.totalorder %s2469_s25, %s2469_s25 }
  0x50   :  { %v3338_v35 = vpack.c.bf16 %v166_v34, %v165_v33  ;;  %v142_v53 = vrot.slane %v4203_v51, %v4201_v50  ;;  %v148_v56 = vrot.slane %v4203_v51, %v4206_v52  ;;  %v2481_v63 = vld [vmem:[%s5340_s3 + $0x80] sm:$0xff]  ;;  %v2483_v4 = vld [vmem:[%s5340_s3 + $0x90] sm:$0xff]  ;;  %v2484_v5 = vld [vmem:[%s5340_s3 + $0x98] sm:$0xff] }
  0x51   :  { %v3342_v3 = vpack.c.bf16 %v2482_v2, %v2481_v63  ;;  %v2491_v16 = vld [vmem:[%s5340_s3 + $0xd0] sm:$0xff]  ;;  %v2493_v19 = vld [vmem:[%s5340_s3 + $0xe0] sm:$0xff]  ;;  %vm3415_vm3 = vmpackc.low %vm593_vm1, %vm593_vm1 }
  0x52   :  { %3317 = vmatpush3.bf16.msra.mxu0 %v3314_v17  ;;  %v2492_v17 = vld [vmem:[%s5340_s3 + $0xd8] sm:$0xff]  ;;  %v2495_v22 = vld [vmem:[%s5340_s3 + $0xf0] sm:$0xff]  ;;  %vm4372_vm7 = vmpackc.low %vm110_vm0, %vm3973_vm6 }
  0x53   :  { %3319 = vmatprep.subr.bf16.mxu0 %v3318_v20  ;;  %3343 = vmatprep.subr.bf16.mxu1 %v3342_v3  ;;  %v3362_v18 = vpack.c.bf16 %v2492_v17, %v2491_v16  ;;  %v412_v16 = vld [vmem:[%s5343_s6 + $0x50] sm:$0xff]  ;;  %v413_v17 = vld [vmem:[%s5343_s6 + $0x58] sm:$0xff] }
  0x54   :  { %3345 = vmatpush3.bf16.msra.mxu1 %v3342_v3 }
  0x56   :  { %3321 = vmatpush3.bf16.msra.mxu0 %v3318_v20  ;;  %v2494_v20 = vld [vmem:[%s5340_s3 + $0xe8] sm:$0xff] }
  0x57   :  { %3323 = vmatprep.subr.bf16.mxu0 %v3322_v23  ;;  %v3366_v21 = vpack.c.bf16 %v2494_v20, %v2493_v19  ;;  %v3394_v19 = vpack.c.bf16 %v413_v17, %v412_v16  ;;  %v415_v20 = vld [vmem:[%s5343_s6 + $0x68] sm:$0xff] }
  0x58   :  { %v677_v16 = vld [vmem:[#allocation8] sm:$0xff] }
  0x5a   :  { %3325 = vmatpush3.bf16.msra.mxu0 %v3322_v23  ;;  %v2496_v23 = vld [vmem:[%s5340_s3 + $0xf8] sm:$0xff] }
  0x5b   :  { %3327 = vmatprep.subr.bf16.mxu0 %v3326_v26  ;;  %v3370_v24 = vpack.c.bf16 %v2496_v23, %v2495_v22  ;;  %v416_v22 = vld [vmem:[%s5343_s6 + $0x70] sm:$0xff]  ;;  %v417_v23 = vld [vmem:[%s5343_s6 + $0x78] sm:$0xff] }
  0x5e   :  { %3329 = vmatpush3.bf16.msra.mxu0 %v3326_v26  ;;  %v170_v26 = vrot.slane %v4203_v51, %v4263_v25 }
  0x5f   :  { %3331 = vmatprep.subr.bf16.mxu0 %v3330_v30 }
  0x62   :  { %3333 = vmatpush3.bf16.msra.mxu0 %v3330_v30 }
  0x63   :  { %3335 = vmatprep.subr.bf16.mxu0 %v3334_v32 }
  0x66   :  { %3337 = vmatpush3.bf16.msra.mxu0 %v3334_v32 }
  0x67   :  { %3339 = vmatprep.subr.bf16.mxu0 %v3338_v35 }
  0x6a   :  { %3341 = vmatpush3.bf16.msra.mxu0 %v3338_v35 }
  0xd7   :  { %v109_v6 = vpop.xlane.xlu0 %108 }
  0xd8   :  { %v114_v7 = vmul.f32 0.00990099, %v109_v6  ;;  %v3346_v6 = vpack.c.bf16 %v2484_v5, %v2483_v4 }
  0xda   :  { %v4146_v8 = vsub.f32 %v4129_v0, %v114_v7  ;;  %v125_v36 = vmul.f32 27.0, %v114_v7  ;;  %3347 = vmatprep.subr.bf16.mxu1 %v3346_v6 }
  0xdb   :  { %v113_v9 = vpop.xlane.xlu0 %112  ;;  %3349 = vmatpush3.bf16.msra.mxu1 %v3346_v6 }
  0xdc   :  { %v115_v10 = vmul.f32 0.00990099, %v113_v9  ;;  %v118_v11 = vmul.f32 %v4146_v8, %v4146_v8  ;;  %v127_v37 = vmul.f32 %v125_v36, %v114_v7  ;;  %v2485_v7 = vld [vmem:[%s5340_s3 + $0xa0] sm:$0xff] }
  0xde   :  { %120 = vadd.xlane.f32.xlu1 %v118_v11  ;;  %v4151_v12 = vsub.f32 %v4134_v1, %v115_v10  ;;  %v126_v39 = vmul.f32 27.0, %v115_v10  ;;  %v2488_v11 = vld [vmem:[%s5340_s3 + $0xb8] sm:$0xff] }
  0xe0   :  { %v119_v13 = vmul.f32 %v4151_v12, %v4151_v12  ;;  %v128_v42 = vmul.f32 %v126_v39, %v115_v10  ;;  %v2487_v10 = vld [vmem:[%s5340_s3 + $0xb0] sm:$0xff] }
  0xe2   :  { %v122_v14 = vsel %vm110_vm0, %v119_v13, 0.0  ;;  %v2489_v13 = vld [vmem:[%s5340_s3 + $0xc0] sm:$0xff] }
  0xe3   :  { %123 = vadd.xlane.f32.xlu1 %v122_v14  ;;  %v2490_v14 = vld [vmem:[%s5340_s3 + $0xc8] sm:$0xff] }
  0xe4   :  { %v3358_v15 = vpack.c.bf16 %v2490_v14, %v2489_v13  ;;  %v410_v13 = vld [vmem:[%s5343_s6 + $0x40] sm:$0xff]  ;;  %v411_v14 = vld [vmem:[%s5343_s6 + $0x48] sm:$0xff] }
 0x16b   :  { %v121_v38 = vpop.xlane.xlu1 %120 }
 0x16c   :  { %v129_v40 = vsub.f32 %v121_v38, %v127_v37 }
 0x16e   :  { %v131_v41 = vmul.f32 0.00990099, %v129_v40 }
 0x170   :  { %v133_v44 = vadd.f32 1e-05, %v131_v41  ;;  %v124_v45 = vpop.xlane.xlu1 %123  ;;  %v4268_v41 = vsub.s32 3, %v4198_v48 }
 0x171   :  { %v130_v46 = vsub.f32 %v124_v45, %v128_v42 }
 0x172   :  { %3767 = vrsqrt.f32 %v133_v44  ;;  %v280_v42 = vrot.slane %v4203_v51, %v4268_v41 }
 0x173   :  { %v132_v47 = vmul.f32 0.00990099, %v130_v46 }
 0x175   :  { %v134_v49 = vadd.f32 1e-05, %v132_v47 }
 0x177   :  { %3769 = vrsqrt.f32 %v134_v49 }
 0x17c   :  { %v3768_v54 = vpop.eup %3767 }
 0x17d   :  { %v137_v55 = vmul.f32 %v3768_v54, %v4146_v8  ;;  %v2486_v8 = vld [vmem:[%s5340_s3 + $0xa8] sm:$0xff] }
 0x17e   :  { %v3350_v9 = vpack.c.bf16 %v2486_v8, %v2485_v7  ;;  %v406_v7 = vld [vmem:[%s5343_s6 + $0x20] sm:$0xff]  ;;  %v407_v8 = vld [vmem:[%s5343_s6 + $0x28] sm:$0xff] }
 0x17f   :  { %v143_v57 = vmul.f32 %v142_v53, %v137_v55 }
 0x180   :  { %3351 = vmatprep.subr.bf16.mxu1 %v3350_v9 }
 0x181   :  { %v3770_v58 = vpop.eup %3769  ;;  %v149_v59 = vadd.f32 %v148_v56, %v143_v57  ;;  %3353 = vmatpush3.bf16.msra.mxu1 %v3350_v9  ;;  %v403_v57 = vld [vmem:[%s5343_s6 + $0x8] sm:$0xff]  ;;  %v3382_v9 = vpack.c.bf16 %v407_v8, %v406_v7 }
 0x182   :  { %v138_v60 = vmul.f32 %v3770_v58, %v4151_v12  ;;  %v3354_v12 = vpack.c.bf16 %v2488_v11, %v2487_v10  ;;  %v405_v58 = vld [vmem:[%s5343_s6 + $0x18] sm:$0xff]  ;;  %v408_v10 = vld [vmem:[%s5343_s6 + $0x30] sm:$0xff] }
 0x183   :  { %2925 = vmatprep.mubr.f32.mxu0 %v149_v59  ;;  %v409_v11 = vld [vmem:[%s5343_s6 + $0x38] sm:$0xff] }
 0x184   :  { %v144_v61 = vmul.f32 %v142_v53, %v138_v60  ;;  %3355 = vmatprep.subr.bf16.mxu1 %v3354_v12 }
 0x185   :  { %3357 = vmatpush3.bf16.msra.mxu1 %v3354_v12  ;;  %v3386_v12 = vpack.c.bf16 %v409_v11, %v408_v10 }
 0x186   :  { %v150_v62 = vadd.f32 %v148_v56, %v144_v61  ;;  %3359 = vmatprep.subr.bf16.mxu1 %v3358_v15  ;;  %v402_v56 = vld [vmem:[%s5343_s6] sm:$0xff] }
 0x188   :  { %2926 = vmatmul.mubr.f32.vlgmr.msra.gmra.mrb[0].mxu0 %v150_v62 }
 0x189   :  { %3361 = vmatpush3.bf16.msra.mxu1 %v3358_v15  ;;  %v3390_v15 = vpack.c.bf16 %v411_v14, %v410_v13 }
 0x18a   :  { %3363 = vmatprep.subr.bf16.mxu1 %v3362_v18 }
 0x18d   :  { %3365 = vmatpush3.bf16.msra.mxu1 %v3362_v18  ;;  %v414_v18 = vld [vmem:[%s5343_s6 + $0x60] sm:$0xff] }
 0x18e   :  { %3367 = vmatprep.subr.bf16.mxu1 %v3366_v21 }
 0x191   :  { %3369 = vmatpush3.bf16.msra.mxu1 %v3366_v21  ;;  %v3398_v21 = vpack.c.bf16 %v415_v20, %v414_v18  ;;  %v678_v18 = vld [vmem:[#allocation8 + $0x8] sm:$0xf] }
 0x192   :  { %3371 = vmatprep.subr.bf16.mxu1 %v3370_v24 }
 0x195   :  { %3373 = vmatpush3.bf16.msra.mxu1 %v3370_v24  ;;  %v3402_v24 = vpack.c.bf16 %v417_v23, %v416_v22 }
 0x25b   :  { %v2927_v27 = vpop.f32.mrb[0].mxu0 }
 0x25c   :  { %v243_v28 = vadd.f32 %v2927_v27, %v170_v26  ;;  %v237_v29 = vpop.f32.mrb[1].mxu0  ;;  %v498_v27 = vld [vmem:[%s5346_s9 + $0x8] sm:$0xff] }
 0x25d   :  { %v238_v30 = vadd.f32 %v237_v29, %v170_v26  ;;  %v497_v26 = vld [vmem:[%s5346_s9] sm:$0xff] }
 0x25e   :  { %v2480_v31 = vmul.f32 -1.442695, %v243_v28 }
 0x25f   :  { %v2479_v32 = vmul.f32 -1.442695, %v238_v30 }
 0x260   :  { %3771 = vpow2.f32 %v2480_v31 }
 0x261   :  { %3773 = vpow2.f32 %v2479_v32 }
 0x26a   :  { %v3772_v33 = vpop.eup %3771 }
 0x26b   :  { %v3774_v34 = vpop.eup %3773  ;;  %v253_v35 = vadd.f32 1.0, %v3772_v33 }
 0x26c   :  { %v252_v36 = vadd.f32 1.0, %v3774_v34 }
 0x26d   :  { %3775 = vrcp.f32 %v253_v35 }
 0x26e   :  { %3777 = vrcp.f32 %v252_v36 }
 0x277   :  { %v3776_v37 = vpop.eup %3775 }
 0x278   :  { %v3778_v38 = vpop.eup %3777  ;;  %v259_v40 = vmul.f32 %v3776_v37, %v243_v28  ;;  %v3406_v28 = vpack.c.bf16 %v498_v27, %v497_v26 }
 0x279   :  { %v258_v39 = vmul.f32 %v3778_v38, %v238_v30 }
 0x27b   :  { %2960 = vmatprep.mubr.f32.mxu1 %v258_v39 }
 0x27c   :  { %2961 = vmatmul.mubr.f32.vlgmr.msra.gmra.mrb[0].mxu1 %v259_v40 }
 0x34f   :  { %v2962_v43 = vpop.f32.mrb[0].mxu1 }
 0x350   :  { %v353_v44 = vadd.f32 %v2962_v43, %v280_v42  ;;  %v347_v45 = vpop.f32.mrb[1].mxu1  ;;  %v4342_v43 = vsub.s32 5, %v4198_v48 }
 0x351   :  { %v348_v46 = vadd.f32 %v347_v45, %v280_v42  ;;  %v4339_v42 = vsub.s32 4, %v4198_v48 }
 0x352   :  { %v357_v47 = vmul.f32 0.5, %v353_v44 }
 0x353   :  { %v356_v49 = vmul.f32 0.5, %v348_v46  ;;  %v393_v44 = vrot.slane %v4203_v51, %v4339_v42 }
 0x354   :  { %v4273_v53 = vadd.f32 %v357_v47, %v4134_v1  ;;  %v404_v1 = vld [vmem:[%s5343_s6 + $0x10] sm:$0xff] }
 0x355   :  { %v4276_v54 = vadd.f32 %v356_v49, %v4129_v0  ;;  %v3374_v0 = vpack.c.bf16 %v403_v57, %v402_v56  ;;  %v3378_v59 = vpack.c.bf16 %v405_v58, %v404_v1  ;;  %v399_v49 = vrot.slane %v4203_v51, %v4342_v43  ;;  %v499_v57 = vld [vmem:[%s5346_s9 + $0x10] sm:$0xff]  ;;  %v500_v1 = vld [vmem:[%s5346_s9 + $0x18] sm:$0xff] }
 0x356   :  { %v362_v55 = vsel %vm110_vm0, %v4273_v53, 0.0 }
 0x357   :  { %363 = vadd.xlane.f32.xlu1 %v362_v55  ;;  %360 = vadd.xlane.f32.xlu0 %v4276_v54 }
 0x358   :  { %3375 = vmatprep.subr.bf16.mxu0 %v3374_v0 }
 0x359   :  { %3377 = vmatpush3.bf16.msra.mxu0 %v3374_v0 }
 0x35a   :  { %3379 = vmatprep.subr.bf16.mxu0 %v3378_v59 }
 0x35d   :  { %3381 = vmatpush3.bf16.msra.mxu0 %v3378_v59 }
 0x35e   :  { %3383 = vmatprep.subr.bf16.mxu0 %v3382_v9 }
 0x361   :  { %3385 = vmatpush3.bf16.msra.mxu0 %v3382_v9 }
 0x362   :  { %3387 = vmatprep.subr.bf16.mxu0 %v3386_v12 }
 0x365   :  { %3389 = vmatpush3.bf16.msra.mxu0 %v3386_v12 }
 0x366   :  { %3391 = vmatprep.subr.bf16.mxu0 %v3390_v15 }
 0x369   :  { %3393 = vmatpush3.bf16.msra.mxu0 %v3390_v15 }
 0x36a   :  { %3395 = vmatprep.subr.bf16.mxu0 %v3394_v19 }
 0x36d   :  { %3397 = vmatpush3.bf16.msra.mxu0 %v3394_v19 }
 0x36e   :  { %3399 = vmatprep.subr.bf16.mxu0 %v3398_v21 }
 0x371   :  { %3401 = vmatpush3.bf16.msra.mxu0 %v3398_v21 }
 0x372   :  { %3403 = vmatprep.subr.bf16.mxu0 %v3402_v24 }
 0x375   :  { %3405 = vmatpush3.bf16.msra.mxu0 %v3402_v24 }
 0x376   :  { %3407 = vmatprep.subr.bf16.mxu0 %v3406_v28 }
 0x3e4   :  { %v364_v60 = vpop.xlane.xlu1 %363  ;;  %v361_v61 = vpop.xlane.xlu0 %360 }
 0x3e5   :  { %v366_v62 = vmul.f32 0.00990099, %v364_v60  ;;  %v365_v63 = vmul.f32 0.00990099, %v361_v61  ;;  %v3410_v60 = vpack.c.bf16 %v500_v1, %v499_v57  ;;  %v501_v61 = vld [vmem:[%s5346_s9 + $0x20] sm:$0xf] }
 0x3e6   :  { %s3971_s9 = smov 92   ;;  %v4385_v57 = vsub.s32 6, %v4198_v48 }
 0x3e7   :  { %v367_v2 = vsub.f32 %v4276_v54, %v365_v63  ;;  %v368_v3 = vsub.f32 %v4273_v53, %v366_v62  ;;  %v376_v29 = vmul.f32 27.0, %v365_v63  ;;  %v377_v30 = vmul.f32 27.0, %v366_v62 }
 0x3e8   :  { %v884_v1 = vrot.slane %v4203_v51, %v4385_v57 }
 0x3e9   :  { %v369_v4 = vmul.f32 %v367_v2, %v367_v2  ;;  %v370_v5 = vmul.f32 %v368_v3, %v368_v3  ;;  %v378_v31 = vmul.f32 %v376_v29, %v365_v63  ;;  %v379_v33 = vmul.f32 %v377_v30, %v366_v62  ;;  %v493_v62 = vld [vmem:[%s5345_s8] sm:$0xff] }
 0x3eb   :  { %371 = vadd.xlane.f32.xlu0 %v369_v4  ;;  %v373_v6 = vsel %vm110_vm0, %v370_v5, 0.0 }
 0x3ec   :  { %374 = vadd.xlane.f32.xlu1 %v373_v6 }
 0x478   :  { %v372_v32 = vpop.xlane.xlu0 %371 }
 0x479   :  { %v380_v34 = vsub.f32 %v372_v32, %v378_v31  ;;  %v375_v35 = vpop.xlane.xlu1 %374 }
 0x47a   :  { %v381_v36 = vsub.f32 %v375_v35, %v379_v33 }
 0x47b   :  { %v382_v37 = vmul.f32 0.00990099, %v380_v34 }
 0x47c   :  { %v383_v38 = vmul.f32 0.00990099, %v381_v36 }
 0x47d   :  { %v384_v39 = vadd.f32 1e-05, %v382_v37 }
 0x47e   :  { %v385_v40 = vadd.f32 1e-05, %v383_v38 }
 0x47f   :  { %3779 = vrsqrt.f32 %v384_v39  ;;  %v2519_v39 = vld [vmem:[%s5348_s11 + $0x18] sm:$0xf] }
 0x480   :  { %3781 = vrsqrt.f32 %v385_v40 }
 0x489   :  { %v3780_v45 = vpop.eup %3779 }
 0x48a   :  { %v3782_v46 = vpop.eup %3781  ;;  %v388_v47 = vmul.f32 %v3780_v45, %v367_v2  ;;  %v494_v2 = vld [vmem:[%s5345_s8 + $0x8] sm:$0xf]  ;;  %s3972_s8 = smov 86  }
 0x48b   :  { %v389_v55 = vmul.f32 %v3782_v46, %v368_v3 }
 0x48c   :  { %v394_v56 = vmul.f32 %v393_v44, %v388_v47 }
 0x48d   :  { %v395_v0 = vmul.f32 %v393_v44, %v389_v55 }
 0x48e   :  { %v400_v58 = vadd.f32 %v399_v49, %v394_v56 }
 0x48f   :  { %v401_v59 = vadd.f32 %v399_v49, %v395_v0  ;;  %v793_v49 = vld [vmem:[#allocation7] sm:$0x3f] }
 0x490   :  { %2995 = vmatprep.mubr.f32.mxu0 %v400_v58 }
 0x491   :  { %2996 = vmatmul.mubr.f32.vlgmr.msra.gmra.mrb[2].mxu0 %v401_v59 }
 0x492   :  { %3409 = vmatpush3.bf16.msra.mxu0 %v3406_v28 }
 0x493   :  { %3411 = vmatprep.subr.bf16.mxu0 %v3410_v60 }
 0x496   :  { %3413 = vmatpush3.bf16.msra.mxu0 %v3410_v60 }
 0x497   :  { %3006 = vmatprep.subr.msk.mxu0 %vm110_vm0, %v501_v61 }
 0x49a   :  { %3007 = vmatpush3.msk.msra.mxu0 %vm110_vm0, %v501_v61 }
 0x564   :  { %v2997_v63 = vpop.f32.mrb[2].mxu0 }
 0x565   :  { %v484_v3 = vpop.f32.mrb[3].mxu0  ;;  %v496_v6 = vmul.f32 %v2997_v63, %v494_v2  ;;  %v930_v2 = vld [vmem:[%s5341_s4 + $0x8] sm:$0xff] }
 0x566   :  { %v495_v4 = vmul.f32 %v493_v62, %v484_v3  ;;  %3015 = vmatprep.mubr.msk.f32.mxu1 %vm593_vm1, %v484_v3  ;;  %v3757_v5 = vpack.i.bf16 %v2997_v63, %v484_v3 }
 0x568   :  { %3758 = vrot.lane.b32.xlu0 %v3757_v5, %s3971_s9  ;;  %3008 = vmatprep.mubr.msk.f32.mxu0 %vm502_vm2, %v495_v4  ;;  %v936_v4 = vld [vmem:[%s5341_s4 + $0x38] sm:$0xff] }
 0x569   :  { %3009 = vmatmul.mubr.msk.f32.vlgmr.msra.gmra.mrb[4].mxu0 %vm502_vm2, %v496_v6  ;;  %v933_v6 = vld [vmem:[%s5341_s4 + $0x20] sm:$0xff] }
 0x5da   :  { %v3759_v7 = vpop.permute.xlu0 %3758 }
 0x5db   :  { %v3761_v8 = vunpack.i.h.bf16 %v3759_v7  ;;  %v3760_v9 = vunpack.i.l.bf16 %v3759_v7 }
 0x5dd   :  { %v3414_v10 = vpack.c.bf16 %v3761_v8, %v3760_v9  ;;  %v931_v9 = vld [vmem:[%s5341_s4 + $0x10] sm:$0xff] }
 0x5df   :  { %3416 = vmatprep.subr.msk.bf16.mxu1 %vm3415_vm3, %v3414_v10 }
 0x5e0   :  { %3419 = vmatpush3.bf16.xpose.msk.msra.mxu1 %vm3415_vm3, %v3414_v10  ;;  %v935_v10 = vld [vmem:[%s5341_s4 + $0x30] sm:$0xff] }
 0x5e1   :  { %3025 = vmatprep.subr.msk.mxu1 %vm800_vm8, %v793_v49 }
 0x5e7   :  { %3016 = vmatmul.mubr.msk.f32.vlgmr.msra.gmra.mrb[2].mxu1 %vm593_vm1, %v2997_v63 }
 0x5e8   :  { %3026 = vmatpush3.msk.msra.mxu1 %vm800_vm8, %v793_v49  ;;  %v951_v49 = vld [vmem:[%s5341_s4 + $0xb0] sm:$0xff] }
 0x63c   :  { %v3010_v11 = vpop.f32.mrb[4].mxu0 }
 0x63d   :  { %v578_v12 = vpop.f32.mrb[5].mxu0 }
 0x6ba   :  { %v3017_v13 = vpop.f32.mrb[2].mxu1 }
 0x6bb   :  { %v674_v14 = vadd.f32 %v3017_v13, %v3010_v11  ;;  %v668_v15 = vpop.f32.mrb[3].mxu1  ;;  %v938_v11 = vld [vmem:[%s5341_s4 + $0x48] sm:$0xff] }
 0x6bc   :  { %v669_v17 = vadd.f32 %v668_v15, %v578_v12  ;;  %v3460_v12 = vpack.c.bf16 %v935_v10, %v931_v9  ;;  %v942_v13 = vld [vmem:[%s5341_s4 + $0x68] sm:$0xff]  ;;  %v944_v15 = vld [vmem:[%s5341_s4 + $0x78] sm:$0xff]  ;;  %v961_v10 = vld [vmem:[%s5341_s4 + $0x100] sm:$0xff] }
 0x6bd   :  { %v680_v21 = vadd.f32 %v678_v18, %v674_v14  ;;  %v940_v14 = vld [vmem:[%s5341_s4 + $0x58] sm:$0xff]  ;;  %v937_v18 = vld [vmem:[%s5341_s4 + $0x40] sm:$0xff] }
 0x6be   :  { %v679_v19 = vadd.f32 %v677_v16, %v669_v17  ;;  %v3430_v16 = vpack.c.bf16 %v942_v13, %v938_v11  ;;  %v3462_v17 = vpack.c.bf16 %v944_v15, %v940_v14  ;;  %v968_v9 = vld [vmem:[%s5341_s4 + $0x138] sm:$0xff]  ;;  %v965_v11 = vld [vmem:[%s5341_s4 + $0x120] sm:$0xff]  ;;  %v963_v14 = vld [vmem:[%s5341_s4 + $0x110] sm:$0xff] }
 0x6bf   :  { %v686_v22 = vsel %vm685_vm5, %v680_v21, -inf  ;;  %v3444_v13 = vpack.c.bf16 %v965_v11, %v961_v10  ;;  %v967_v15 = vld [vmem:[%s5341_s4 + $0x130] sm:$0xff] }
 0x6c0   :  { %v682_v20 = vsel %vm681_vm4, %v679_v19, -inf }
 0x6c1   :  { %683 = vmax.xlane.f32.xlu1 %v682_v20  ;;  %v939_v20 = vld [vmem:[%s5341_s4 + $0x50] sm:$0xff] }
 0x6c5   :  { %687 = vmax.xlane.f32.xlu1 %v686_v22  ;;  %v943_v22 = vld [vmem:[%s5341_s4 + $0x70] sm:$0xff] }
 0x74e   :  { %v684_v23 = vpop.xlane.xlu1 %683 }
 0x74f   :  { %v689_v24 = vsub.f32 %v679_v19, %v684_v23  ;;  %v941_v19 = vld [vmem:[%s5341_s4 + $0x60] sm:$0xff]  ;;  %v946_v23 = vld [vmem:[%s5341_s4 + $0x88] sm:$0xff] }
 0x751   :  { %v691_v28 = vmul.f32 1.442695, %v689_v24  ;;  %v950_v24 = vld [vmem:[%s5341_s4 + $0xa8] sm:$0xff] }
 0x752   :  { %v688_v26 = vpop.xlane.xlu1 %687 }
 0x753   :  { %v690_v27 = vsub.f32 %v680_v21, %v688_v26  ;;  %v3432_v21 = vpack.c.bf16 %v941_v19, %v937_v18  ;;  %v3464_v26 = vpack.c.bf16 %v943_v22, %v939_v20  ;;  %v974_v18 = vld [vmem:[%s5341_s4 + $0x168] sm:$0xff]  ;;  %v972_v19 = vld [vmem:[%s5341_s4 + $0x158] sm:$0xff]  ;;  %v969_v22 = vld [vmem:[%s5341_s4 + $0x140] sm:$0xff] }
 0x755   :  { %v693_v29 = vmul.f32 1.442695, %v690_v27  ;;  %v3434_v27 = vpack.c.bf16 %v950_v24, %v946_v23  ;;  %v973_v23 = vld [vmem:[%s5341_s4 + $0x160] sm:$0xff] }
 0x757   :  { %3783 = vpow2.f32 %v693_v29  ;;  %v952_v29 = vld [vmem:[%s5341_s4 + $0xb8] sm:$0xff] }
 0x758   :  { %3785 = vpow2.f32 %v691_v28  ;;  %v948_v28 = vld [vmem:[%s5341_s4 + $0x98] sm:$0xff] }
 0x761   :  { %v3784_v30 = vpop.eup %3783 }
 0x762   :  { %v698_v31 = vsel %vm685_vm5, %v3784_v30, 0.0  ;;  %v3786_v32 = vpop.eup %3785 }
 0x763   :  { %699 = vadd.xlane.f32.xlu1 %v698_v31  ;;  %v695_v33 = vsel %vm681_vm4, %v3786_v32, 0.0 }
 0x767   :  { %696 = vadd.xlane.f32.xlu1 %v695_v33 }
 0x778   :  { %3763 = vrot.lane.b32.xlu1 %v3757_v5, %s3972_s8  ;;  %v929_v5 = vld [vmem:[%s5341_s4] sm:$0xff] }
 0x779   :  { %v3428_v8 = vpack.c.bf16 %v933_v6, %v929_v5  ;;  %v962_v5 = vld [vmem:[%s5341_s4 + $0x108] sm:$0xff] }
 0x77a   :  { %v966_v6 = vld [vmem:[%s5341_s4 + $0x128] sm:$0xff] }
 0x7f0   :  { %v700_v34 = vpop.xlane.xlu1 %699 }
 0x7f1   :  { %3787 = vrcp.f32 %v700_v34 }
 0x7f4   :  { %v697_v35 = vpop.xlane.xlu1 %696 }
 0x7f5   :  { %3789 = vrcp.f32 %v697_v35 }
 0x7f8   :  { %v3764_v36 = vpop.permute.xlu1 %3763 }
 0x7f9   :  { %v3766_v37 = vunpack.i.h.bf16 %v3764_v36  ;;  %v3765_v38 = vunpack.i.l.bf16 %v3764_v36 }
 0x7fb   :  { %v3420_v40 = vpack.c.bf16 %v3766_v37, %v3765_v38  ;;  %v3788_v44 = vpop.eup %3787 }
 0x7fc   :  { %v704_v47 = vmul.f32 %v3788_v44, %v3784_v30  ;;  %v3466_v30 = vpack.c.bf16 %v952_v29, %v948_v28  ;;  %v945_v44 = vld [vmem:[%s5341_s4 + $0x80] sm:$0xff]  ;;  %v975_v28 = vld [vmem:[%s5341_s4 + $0x170] sm:$0xff]  ;;  %v978_v29 = vld [vmem:[%s5341_s4 + $0x188] sm:$0xff] }
 0x7fd   :  { %3422 = vmatprep.subr.msk.bf16.mxu0 %vm4372_vm7, %v3420_v40 }
 0x7fe   :  { %3425 = vmatpush3.bf16.msk.msra.mxu0 %vm4372_vm7, %v3420_v40 }
 0x7ff   :  { %v3790_v45 = vpop.eup %3789 }
 0x800   :  { %v703_v46 = vmul.f32 %v3790_v45, %v3786_v32  ;;  %v949_v45 = vld [vmem:[%s5341_s4 + $0xa0] sm:$0xff] }
 0x802   :  { %3022 = vmatprep.mubr.msk.f32.mxu0 %vm681_vm4, %v703_v46  ;;  %v947_v46 = vld [vmem:[%s5341_s4 + $0x90] sm:$0xff] }
 0x803   :  { %3023 = vmatmul.mubr.msk.f32.vlgmr.msra.gmra.mrb[6].mxu0 %vm681_vm4, %v704_v47  ;;  %v3436_v47 = vpack.c.bf16 %v949_v45, %v945_v44  ;;  %v977_v45 = vld [vmem:[%s5341_s4 + $0x180] sm:$0xff] }
 0x8d6   :  { %v3024_v55 = vpop.f32.mrb[6].mxu0 }
 0x8d7   :  { %v784_v56 = vpop.f32.mrb[7].mxu0 }
 0x8d8   :  { %3027 = vmatprep.mubr.msk.f32.mxu1 %vm593_vm1, %v784_v56  ;;  %v954_v56 = vld [vmem:[%s5341_s4 + $0xc8] sm:$0xff] }
 0x8d9   :  { %3028 = vmatmul.mubr.msk.f32.vlgmr.msra.gmra.mrb[4].mxu1 %vm593_vm1, %v3024_v55  ;;  %v3468_v55 = vpack.c.bf16 %v951_v49, %v947_v46  ;;  %v981_v46 = vld [vmem:[%s5341_s4 + $0x1a0] sm:$0xff] }
 0x8da   :  { %v3452_v49 = vpack.c.bf16 %v981_v46, %v977_v45 }
 0x9ac   :  { %v3029_v0 = vpop.f32.mrb[4].mxu1 }
 0x9ad   :  { %v880_v58 = vadd.f32 %v3029_v0, %v4273_v53  ;;  %v870_v59 = vpop.f32.mrb[5].mxu1  ;;  %v934_v53 = vld [vmem:[%s5341_s4 + $0x28] sm:$0xff]  ;;  %v956_v0 = vld [vmem:[%s5341_s4 + $0xd8] sm:$0xff] }
 0x9ae   :  { %v879_v60 = vadd.f32 %v870_v59, %v4276_v54  ;;  %v932_v54 = vld [vmem:[%s5341_s4 + $0x18] sm:$0xff]  ;;  %v3426_v3 = vpack.c.bf16 %v934_v53, %v930_v2 }
 0x9af   :  { %v4391_v61 = vadd.f32 %v884_v1, %v880_v58  ;;  %v3458_v7 = vpack.c.bf16 %v936_v4, %v932_v54  ;;  %v960_v59 = vld [vmem:[%s5341_s4 + $0xf8] sm:$0xff]  ;;  %v955_v54 = vld [vmem:[%s5341_s4 + $0xd0] sm:$0xff] }
 0x9b0   :  { %v4393_v62 = vadd.f32 %v884_v1, %v879_v60  ;;  %3427 = vmatprep.subr.bf16.mxu1 %v3426_v3  ;;  %v958_v1 = vld [vmem:[%s5341_s4 + $0xe8] sm:$0xff]  ;;  %v953_v60 = vld [vmem:[%s5341_s4 + $0xc0] sm:$0xff]  ;;  %v3470_v2 = vpack.c.bf16 %v960_v59, %v956_v0  ;;  %v959_v3 = vld [vmem:[%s5341_s4 + $0xf0] sm:$0xff] }
 0x9b1   :  { %v889_v63 = vsel %vm110_vm0, %v4391_v61, 0.0  ;;  %3459 = vmatprep.subr.bf16.mxu0 %v3458_v7  ;;  %3429 = vmatpush1.bf16.msra.mxu1 %v3428_v8  ;;  %v3438_v58 = vpack.c.bf16 %v958_v1, %v954_v56  ;;  %v3472_v4 = vpack.c.bf16 %v959_v3, %v955_v54  ;;  %v964_v7 = vld [vmem:[%s5341_s4 + $0x118] sm:$0xff]  ;;  %v3442_v8 = vpack.c.bf16 %v966_v6, %v962_v5  ;;  %v986_v56 = vld [vmem:[%s5341_s4 + $0x1c8] sm:$0xff]  ;;  %v987_v54 = vld [vmem:[%s5341_s4 + $0x1d0] sm:$0xff] }
 0x9b2   :  { %890 = vadd.xlane.f32.xlu1 %v889_v63  ;;  %887 = vadd.xlane.f32.xlu0 %v4393_v62  ;;  %v957_v63 = vld [vmem:[%s5341_s4 + $0xe0] sm:$0xff]  ;;  %v990_v1 = vld [vmem:[%s5341_s4 + $0x1e8] sm:$0xff]  ;;  %v988_v59 = vld [vmem:[%s5341_s4 + $0x1d8] sm:$0xff] }
 0x9b3   :  { %3461 = vmatpush1.bf16.msra.mxu0 %v3460_v12  ;;  %3431 = vmatprep.subr.bf16.mxu1 %v3430_v16  ;;  %v3440_v53 = vpack.c.bf16 %v957_v63, %v953_v60  ;;  %v3474_v12 = vpack.c.bf16 %v968_v9, %v964_v7  ;;  %v3476_v16 = vpack.c.bf16 %v967_v15, %v963_v14  ;;  %v992_v60 = vld [vmem:[%s5341_s4 + $0x1f8] sm:$0xff]  ;;  %v985_v63 = vld [vmem:[%s5341_s4 + $0x1c0] sm:$0xff]  ;;  %v991_v3 = vld [vmem:[%s5341_s4 + $0x1f0] sm:$0xff] }
 0x9b4   :  { %3463 = vmatprep.subr.bf16.mxu0 %v3462_v17  ;;  %v970_v17 = vld [vmem:[%s5341_s4 + $0x148] sm:$0xff]  ;;  %v3488_v5 = vpack.c.bf16 %v991_v3, %v987_v54 }
 0x9b5   :  { %3433 = vmatpush1.bf16.msra.mxu1 %v3432_v21  ;;  %v3446_v20 = vpack.c.bf16 %v974_v18, %v970_v17  ;;  %v976_v21 = vld [vmem:[%s5341_s4 + $0x178] sm:$0xff]  ;;  %v4614_v18 = vsub.s32 7, %v4198_v48 }
 0x9b6   :  { %3435 = vmatprep.subr.bf16.mxu1 %v3434_v27  ;;  %v3478_v24 = vpack.c.bf16 %v976_v21, %v972_v19  ;;  %v971_v27 = vld [vmem:[%s5341_s4 + $0x150] sm:$0xff]  ;;  %v4616_v19 = vld [vmem:[#allocation2 + $0x8] sm:$0xff] }
 0x9b7   :  { %3465 = vmatpush1.bf16.msra.mxu0 %v3464_v26  ;;  %v3448_v26 = vpack.c.bf16 %v973_v23, %v969_v22 }
 0x9b8   :  { %3467 = vmatprep.subr.bf16.mxu0 %v3466_v30  ;;  %v3480_v30 = vpack.c.bf16 %v975_v28, %v971_v27 }
 0x9b9   :  { %3437 = vmatpush1.bf16.msra.mxu1 %v3436_v47  ;;  %v979_v47 = vld [vmem:[%s5341_s4 + $0x190] sm:$0xff] }
 0x9ba   :  { %3439 = vmatprep.subr.bf16.mxu1 %v3438_v58  ;;  %v3454_v58 = vpack.c.bf16 %v990_v1, %v986_v56 }
 0x9bb   :  { %3469 = vmatpush1.bf16.msra.mxu0 %v3468_v55  ;;  %v983_v55 = vld [vmem:[%s5341_s4 + $0x1b0] sm:$0xff] }
 0x9bc   :  { %3471 = vmatprep.subr.bf16.mxu0 %v3470_v2  ;;  %v3484_v0 = vpack.c.bf16 %v983_v55, %v979_v47  ;;  %v3486_v2 = vpack.c.bf16 %v992_v60, %v988_v59 }
 0x9bd   :  { %3441 = vmatpush1.bf16.msra.mxu1 %v3440_v53  ;;  %v989_v53 = vld [vmem:[%s5341_s4 + $0x1e0] sm:$0xff] }
 0x9be   :  { %3443 = vmatprep.subr.bf16.mxu1 %v3442_v8 }
 0x9bf   :  { %3473 = vmatpush1.bf16.msra.mxu0 %v3472_v4  ;;  %v3456_v4 = vpack.c.bf16 %v989_v53, %v985_v63 }
 0x9c0   :  { %3475 = vmatprep.subr.bf16.mxu0 %v3474_v12 }
 0x9c1   :  { %3445 = vmatpush1.bf16.msra.mxu1 %v3444_v13 }
 0x9c2   :  { %3447 = vmatprep.subr.bf16.mxu1 %v3446_v20 }
 0x9c3   :  { %3477 = vmatpush1.bf16.msra.mxu0 %v3476_v16 }
 0x9c4   :  { %3479 = vmatprep.subr.bf16.mxu0 %v3478_v24 }
 0x9c5   :  { %3449 = vmatpush1.bf16.msra.mxu1 %v3448_v26 }
 0x9c7   :  { %3481 = vmatpush1.bf16.msra.mxu0 %v3480_v30 }
 0xa3f   :  { %v891_v31 = vpop.xlane.xlu1 %890  ;;  %v888_v32 = vpop.xlane.xlu0 %887 }
 0xa40   :  { %v4458_v33 = vmul.f32 0.00990099, %v891_v31  ;;  %v4460_v34 = vmul.f32 0.00990099, %v888_v32  ;;  %v982_v31 = vld [vmem:[%s5341_s4 + $0x1a8] sm:$0xff]  ;;  %v980_v32 = vld [vmem:[%s5341_s4 + $0x198] sm:$0xff] }
 0xa42   :  { %v4464_v35 = vsub.f32 %v4393_v62, %v4460_v34  ;;  %v4468_v36 = vsub.f32 %v4391_v61, %v4458_v33  ;;  %v903_v6 = vmul.f32 27.0, %v4460_v34  ;;  %v904_v8 = vmul.f32 27.0, %v4458_v33 }
 0xa44   :  { %v896_v37 = vmul.f32 %v4464_v35, %v4464_v35  ;;  %v897_v38 = vmul.f32 %v4468_v36, %v4468_v36  ;;  %v905_v7 = vmul.f32 %v903_v6, %v4460_v34  ;;  %v906_v12 = vmul.f32 %v904_v8, %v4458_v33 }
 0xa45   :  { %v920_v34 = vrot.slane %v4203_v51, %v4614_v18  ;;  %v926_v33 = vrot.slane %v4616_v19, %v4201_v50  ;;  %v4628_v51 = vld [vmem:[#allocation5] sm:$0xff] }
 0xa46   :  { %898 = vadd.xlane.f32.xlu0 %v896_v37  ;;  %v900_v40 = vsel %vm110_vm0, %v897_v38, 0.0  ;;  %v984_v37 = vld [vmem:[%s5341_s4 + $0x1b8] sm:$0xff]  ;;  %v3974_v38 = vmov 0.0  }
 0xa47   :  { %1057 = vmatprep.mubr.f32.mxu1 %v3974_v38  ;;  %v3482_v44 = vpack.c.bf16 %v984_v37, %v980_v32  ;;  %1134 = vmatprep.mubr.f32.mxu0 %v3974_v38 }
 0xa49   :  { %3483 = vmatprep.subr.bf16.mxu0 %v3482_v44 }
 0xa4a   :  { %901 = vadd.xlane.f32.xlu0 %v900_v40  ;;  %v3450_v40 = vpack.c.bf16 %v982_v31, %v978_v29  ;;  %3485 = vmatpush1.bf16.msra.mxu0 %v3484_v0 }
 0xa4b   :  { %3487 = vmatprep.subr.bf16.mxu0 %v3486_v2 }
 0xa4c   :  { %3451 = vmatprep.subr.bf16.mxu1 %v3450_v40 }
 0xa4d   :  { %3453 = vmatpush1.bf16.msra.mxu1 %v3452_v49 }
 0xa4e   :  { %3455 = vmatprep.subr.bf16.mxu1 %v3454_v58  ;;  %3489 = vmatpush1.bf16.msra.mxu0 %v3488_v5  ;;  %v1150_v5 = vrot.slane %v4628_v51, %v4385_v57 }
 0xa51   :  { %3457 = vmatpush1.bf16.msra.mxu1 %v3456_v4 }
 0xad3   :  { %v899_v9 = vpop.xlane.xlu0 %898 }
 0xad4   :  { %v907_v10 = vsub.f32 %v899_v9, %v905_v7 }
 0xad6   :  { %v909_v11 = vmul.f32 0.00990099, %v907_v10 }
 0xad7   :  { %v902_v13 = vpop.xlane.xlu0 %901 }
 0xad8   :  { %v911_v14 = vadd.f32 1e-05, %v909_v11  ;;  %v908_v15 = vsub.f32 %v902_v13, %v906_v12 }
 0xada   :  { %3791 = vrsqrt.f32 %v911_v14  ;;  %v910_v16 = vmul.f32 0.00990099, %v908_v15 }
 0xadc   :  { %v912_v17 = vadd.f32 1e-05, %v910_v16 }
 0xade   :  { %3793 = vrsqrt.f32 %v912_v17 }
 0xae4   :  { %v3792_v20 = vpop.eup %3791 }
 0xae5   :  { %v915_v21 = vmul.f32 %v3792_v20, %v4464_v35  ;;  %v4630_v35 = vld [vmem:[#allocation5 + $0x8] sm:$0xff] }
 0xae6   :  { %v1166_v28 = vrot.slane %v4630_v35, %v4614_v18  ;;  %v1154_v6 = vrot.slane %v4630_v35, %v4385_v57 }
 0xae7   :  { %v921_v22 = vmul.f32 %v920_v34, %v915_v21 }
 0xae8   :  { %v3794_v23 = vpop.eup %3793 }
 0xae9   :  { %v927_v24 = vadd.f32 %v926_v33, %v921_v22  ;;  %v916_v26 = vmul.f32 %v3794_v23, %v4468_v36  ;;  %v1162_v36 = vrot.slane %v4628_v51, %v4614_v18  ;;  %v2518_v22 = vld [vmem:[%s5348_s11 + $0x10] sm:$0xff]  ;;  %v1200_v23 = vld [vmem:[%s5348_s11 + $0x8] sm:$0xf] }
 0xaeb   :  { %1058 = vmatmul.mubr.f32.vlgmr.msra.gmra.mrb[6].mxu1 %v927_v24  ;;  %1135 = vmatmul.mubr.f32.vlgmr.msra.gmra.mrb[8].mxu0 %v927_v24  ;;  %v922_v48 = vmul.f32 %v920_v34, %v916_v26  ;;  %v1500_v24 = vld [vmem:[%s5342_s5 + $0x80] sm:$0xff]  ;;  %v1501_v26 = vld [vmem:[%s5342_s5 + $0x88] sm:$0xff] }
 0xaec   :  { %1063 = vmatprep.mubr.f32.mxu1 %v3974_v38  ;;  %1140 = vmatprep.mubr.f32.mxu0 %v3974_v38 }
 0xaed   :  { %v928_v27 = vadd.f32 %v926_v33, %v922_v48  ;;  %v1199_v33 = vld [vmem:[%s5348_s11] sm:$0xff]  ;;  %v3502_v48 = vpack.c.bf16 %v1501_v26, %v1500_v24  ;;  %v1499_v24 = vld [vmem:[%s5342_s5 + $0x78] sm:$0xff] }
 0xaef   :  { %1064 = vmatmul.mubr.f32.gmra.mrb[8].mxu1 %v928_v27  ;;  %1141 = vmatmul.mubr.f32.gmra.mrb[10].mxu0 %v928_v27  ;;  %v1484_v27 = vld [vmem:[%s5342_s5] sm:$0xff] }
 0xaf0   :  { %1277 = vmatprep.mubr.f32.mxu1 %v3974_v38  ;;  %1363 = vmatprep.mubr.f32.mxu0 %v3974_v38 }
 0xbbe   :  { %v1059_v29 = vpop.f32.mrb[6].mxu1  ;;  %v1136_v30 = vpop.f32.mrb[8].mxu0 }
 0xbbf   :  { %v1167_v31 = vadd.f32 %v1162_v36, %v1136_v30  ;;  %v1061_v32 = vpop.f32.mrb[7].mxu1  ;;  %v1138_v37 = vpop.f32.mrb[9].mxu0  ;;  %v1155_v7 = vadd.f32 %v1150_v5, %v1059_v29  ;;  %v1502_v29 = vld [vmem:[%s5342_s5 + $0x90] sm:$0xff]  ;;  %v1503_v30 = vld [vmem:[%s5342_s5 + $0x98] sm:$0xff] }
 0xbc0   :  { %v1168_v40 = vadd.f32 %v1166_v28, %v1138_v37  ;;  %v1156_v9 = vadd.f32 %v1154_v6, %v1061_v32  ;;  %v1486_v32 = vld [vmem:[%s5342_s5 + $0x10] sm:$0xff]  ;;  %v1487_v37 = vld [vmem:[%s5342_s5 + $0x18] sm:$0xff] }
 0xbc1   :  { %v2510_v44 = vmul.f32 -1.442695, %v1167_v31  ;;  %v3506_v31 = vpack.c.bf16 %v1503_v30, %v1502_v29  ;;  %v1395_v29 = vrot.slane %v4630_v35, %v4206_v52  ;;  %v1411_v30 = vrot.slane %v4630_v35, %v4263_v25 }
 0xbc2   :  { %v2511_v45 = vmul.f32 -1.442695, %v1168_v40  ;;  %v1065_v46 = vpop.f32.mrb[8].mxu1  ;;  %v1142_v47 = vpop.f32.mrb[10].mxu0  ;;  %v3508_v40 = vpack.c.bf16 %v1487_v37, %v1486_v32 }
 0xbc3   :  { %3795 = vpow2.f32 %v2510_v44  ;;  %v1169_v49 = vadd.f32 %v1162_v36, %v1142_v47  ;;  %v1067_v55 = vpop.f32.mrb[9].mxu1  ;;  %v1144_v56 = vpop.f32.mrb[11].mxu0  ;;  %v1157_v13 = vadd.f32 %v1150_v5, %v1065_v46  ;;  %v1485_v36 = vld [vmem:[%s5342_s5 + $0x8] sm:$0xff]  ;;  %v1504_v44 = vld [vmem:[%s5342_s5 + $0xa0] sm:$0xff]  ;;  %v1510_v5 = vld [vmem:[%s5342_s5 + $0xd0] sm:$0xff] }
 0xbc4   :  { %3797 = vpow2.f32 %v2511_v45  ;;  %v1170_v1 = vadd.f32 %v1166_v28, %v1144_v56  ;;  %v1158_v15 = vadd.f32 %v1154_v6, %v1067_v55  ;;  %v3504_v28 = vpack.c.bf16 %v1485_v36, %v1484_v27  ;;  %v1505_v45 = vld [vmem:[%s5342_s5 + $0xa8] sm:$0xff]  ;;  %v1488_v47 = vld [vmem:[%s5342_s5 + $0x20] sm:$0xff]  ;;  %v1506_v56 = vld [vmem:[%s5342_s5 + $0xb0] sm:$0xff] }
 0xbc5   :  { %v2512_v0 = vmul.f32 -1.442695, %v1169_v49  ;;  %v3510_v46 = vpack.c.bf16 %v1505_v45, %v1504_v44  ;;  %v1489_v49 = vld [vmem:[%s5342_s5 + $0x28] sm:$0xff]  ;;  %v1511_v6 = vld [vmem:[%s5342_s5 + $0xd8] sm:$0xff]  ;;  %v1391_v27 = vrot.slane %v4628_v51, %v4206_v52  ;;  %v1407_v36 = vrot.slane %v4628_v51, %v4263_v25 }
 0xbc6   :  { %v2513_v58 = vmul.f32 -1.442695, %v1170_v1  ;;  %v3512_v55 = vpack.c.bf16 %v1489_v49, %v1488_v47  ;;  %v1507_v1 = vld [vmem:[%s5342_s5 + $0xb8] sm:$0xff] }
 0xbc7   :  { %3799 = vpow2.f32 %v2512_v0  ;;  %v3514_v0 = vpack.c.bf16 %v1507_v1, %v1506_v56 }
 0xbc8   :  { %3801 = vpow2.f32 %v2513_v58  ;;  %v1490_v58 = vld [vmem:[%s5342_s5 + $0x30] sm:$0xff] }
 0xbcd   :  { %v3796_v59 = vpop.eup %3795 }
 0xbce   :  { %v3798_v60 = vpop.eup %3797  ;;  %v1183_v63 = vadd.f32 1.0, %v3796_v59  ;;  %v1491_v59 = vld [vmem:[%s5342_s5 + $0x38] sm:$0xff] }
 0xbcf   :  { %v1184_v2 = vadd.f32 1.0, %v3798_v60  ;;  %v3516_v60 = vpack.c.bf16 %v1491_v59, %v1490_v58 }
 0xbd0   :  { %3803 = vrcp.f32 %v1183_v63  ;;  %v1508_v63 = vld [vmem:[%s5342_s5 + $0xc0] sm:$0xff] }
 0xbd1   :  { %v3800_v53 = vpop.eup %3799  ;;  %3805 = vrcp.f32 %v1184_v2  ;;  %v1509_v2 = vld [vmem:[%s5342_s5 + $0xc8] sm:$0xff] }
 0xbd2   :  { %v3802_v54 = vpop.eup %3801  ;;  %v1185_v3 = vadd.f32 1.0, %v3800_v53  ;;  %v3518_v53 = vpack.c.bf16 %v1509_v2, %v1508_v63  ;;  %v1435_v2 = vrot.slane %v4628_v51, %v4339_v42 }
 0xbd3   :  { %v1186_v4 = vadd.f32 1.0, %v3802_v54  ;;  %v1492_v54 = vld [vmem:[%s5342_s5 + $0x40] sm:$0xff] }
 0xbd4   :  { %3807 = vrcp.f32 %v1185_v3  ;;  %v1493_v3 = vld [vmem:[%s5342_s5 + $0x48] sm:$0xff] }
 0xbd5   :  { %3809 = vrcp.f32 %v1186_v4  ;;  %v3520_v4 = vpack.c.bf16 %v1493_v3, %v1492_v54 }
 0xbda   :  { %v3804_v8 = vpop.eup %3803 }
 0xbdb   :  { %v3806_v10 = vpop.eup %3805  ;;  %v4640_v11 = vmul.f32 %v3804_v8, %v1155_v7  ;;  %v3522_v7 = vpack.c.bf16 %v1511_v6, %v1510_v5  ;;  %v1494_v8 = vld [vmem:[%s5342_s5 + $0x50] sm:$0xff]  ;;  %v1439_v5 = vrot.slane %v4630_v35, %v4339_v42 }
 0xbdc   :  { %v4642_v12 = vmul.f32 %v3806_v10, %v1156_v9  ;;  %v1495_v9 = vld [vmem:[%s5342_s5 + $0x58] sm:$0xff] }
 0xbdd   :  { %v3524_v10 = vpack.c.bf16 %v1495_v9, %v1494_v8 }
 0xbde   :  { %v3808_v14 = vpop.eup %3807  ;;  %v1397_v49 = vmul.f32 %v1395_v29, %v4642_v12 }
 0xbdf   :  { %v3810_v16 = vpop.eup %3809  ;;  %v4644_v17 = vmul.f32 %v3808_v14, %v1157_v13  ;;  %v1512_v13 = vld [vmem:[%s5342_s5 + $0xe0] sm:$0xff]  ;;  %v1513_v14 = vld [vmem:[%s5342_s5 + $0xe8] sm:$0xff] }
 0xbe0   :  { %v4646_v34 = vmul.f32 %v3810_v16, %v1158_v15  ;;  %v3526_v15 = vpack.c.bf16 %v1513_v14, %v1512_v13  ;;  %v1496_v16 = vld [vmem:[%s5342_s5 + $0x60] sm:$0xff]  ;;  %v1451_v13 = vrot.slane %v4630_v35, %v4342_v43 }
 0xbe1   :  { %v3493_v20 = vpack.c.bf16 %v4644_v17, %v4640_v11  ;;  %v1398_v59 = vmul.f32 %v1391_v27, %v4644_v17  ;;  %v1447_v17 = vrot.slane %v4628_v51, %v4342_v43 }
 0xbe2   :  { %v3490_v21 = vpack.c.bf16 %v4646_v34, %v4642_v12 }
 0xbe4   :  { %3492 = vmatprep.subr.msk.bf16.mxu1 %vm4372_vm7, %v3490_v21  ;;  %3498 = vmatprep.subr.msk.bf16.mxu0 %vm4372_vm7, %v3490_v21 }
 0xbe5   :  { %3495 = vmatpush1.bf16.msk.msra.mxu1 %vm4372_vm7, %v3493_v20  ;;  %3501 = vmatpush1.bf16.msk.msra.mxu0 %vm4372_vm7, %v3493_v20  ;;  %v1497_v20 = vld [vmem:[%s5342_s5 + $0x68] sm:$0xff] }
 0xbe6   :  { %3503 = vmatprep.subr.bf16.mxu1 %v3502_v48  ;;  %v3528_v21 = vpack.c.bf16 %v1497_v20, %v1496_v16  ;;  %v1379_v48 = vrot.slane %v4628_v51, %v4201_v50 }
 0xbe8   :  { %2516 = vmatmul.mubr.msk.f32.vlgmr.msra.gmra.mrb[10].mxu1 %vm681_vm4, %v1199_v33  ;;  %2522 = vmatmul.mubr.msk.f32.vlgmr.msra.gmra.mrb[12].mxu0 %vm681_vm4, %v2518_v22  ;;  %v1514_v33 = vld [vmem:[%s5342_s5 + $0xf0] sm:$0xff]  ;;  %v1515_v22 = vld [vmem:[%s5342_s5 + $0xf8] sm:$0xff] }
 0xbe9   :  { %1283 = vmatprep.mubr.f32.mxu1 %v3974_v38  ;;  %1369 = vmatprep.mubr.f32.mxu0 %v3974_v38 }
 0xbea   :  { %3505 = vmatpush3.bf16.msra.mxu1 %v3504_v28  ;;  %v1383_v28 = vrot.slane %v4630_v35, %v4201_v50  ;;  %v1423_v50 = vrot.slane %v4628_v51, %v4268_v41 }
 0xbeb   :  { %3507 = vmatprep.subr.bf16.mxu1 %v3506_v31 }
 0xbec   :  { %2517 = vmatmul.mubr.msk.f32.gmra.mrb[12].mxu1 %vm681_vm4, %v1200_v23  ;;  %2523 = vmatmul.mubr.msk.f32.gmra.mrb[14].mxu0 %vm681_vm4, %v2519_v39  ;;  %v3530_v23 = vpack.c.bf16 %v1515_v22, %v1514_v33  ;;  %v1498_v39 = vld [vmem:[%s5342_s5 + $0x70] sm:$0xff] }
 0xbed   :  { %v3532_v26 = vpack.c.bf16 %v1499_v24, %v1498_v39 }
 0xbee   :  { %3509 = vmatpush3.bf16.msra.mxu1 %v3508_v40  ;;  %v1396_v40 = vmul.f32 %v1391_v27, %v4640_v11  ;;  %v1399_v11 = vmul.f32 %v1395_v29, %v4646_v34 }
 0xbef   :  { %3511 = vmatprep.subr.bf16.mxu1 %v3510_v46 }
 0xbf2   :  { %3513 = vmatpush3.bf16.msra.mxu1 %v3512_v55 }
 0xbf3   :  { %3515 = vmatprep.subr.bf16.mxu1 %v3514_v0  ;;  %v1427_v0 = vrot.slane %v4630_v35, %v4268_v41 }
 0xbf6   :  { %3517 = vmatpush3.bf16.msra.mxu1 %v3516_v60 }
 0xbf7   :  { %3519 = vmatprep.subr.bf16.mxu1 %v3518_v53 }
 0xbfa   :  { %3521 = vmatpush3.bf16.msra.mxu1 %v3520_v4 }
 0xbfb   :  { %3523 = vmatprep.subr.bf16.mxu1 %v3522_v7 }
 0xbfe   :  { %3525 = vmatpush3.bf16.msra.mxu1 %v3524_v10 }
 0xbff   :  { %3527 = vmatprep.subr.bf16.mxu1 %v3526_v15 }
 0xc02   :  { %3529 = vmatpush3.bf16.msra.mxu1 %v3528_v21 }
 0xc03   :  { %3531 = vmatprep.subr.bf16.mxu1 %v3530_v23 }
 0xc06   :  { %3533 = vmatpush3.bf16.msra.mxu1 %v3532_v26 }
 0xcbb   :  { %v1279_v31 = vpop.f32.mrb[10].mxu1  ;;  %v1365_v32 = vpop.f32.mrb[12].mxu0 }
 0xcbc   :  { %v1384_v37 = vmul.f32 %v1379_v48, %v1279_v31  ;;  %v1281_v44 = vpop.f32.mrb[11].mxu1  ;;  %v1412_v45 = vmul.f32 %v1407_v36, %v1365_v32  ;;  %v1367_v46 = vpop.f32.mrb[13].mxu0 }
 0xcbd   :  { %v1385_v47 = vmul.f32 %v1383_v28, %v1281_v44  ;;  %v1413_v55 = vmul.f32 %v1411_v30, %v1367_v46 }
 0xcbe   :  { %v1400_v56 = vadd.f32 %v1396_v40, %v1384_v37 }
 0xcbf   :  { %v1401_v1 = vadd.f32 %v1397_v49, %v1385_v47  ;;  %v1285_v58 = vpop.f32.mrb[12].mxu1  ;;  %v1371_v60 = vpop.f32.mrb[14].mxu0 }
 0xcc0   :  { %v1416_v63 = vadd.f32 %v1412_v45, %v1400_v56  ;;  %v1386_v12 = vmul.f32 %v1379_v48, %v1285_v58  ;;  %v1287_v53 = vpop.f32.mrb[13].mxu1  ;;  %v1414_v54 = vmul.f32 %v1407_v36, %v1371_v60  ;;  %v1373_v3 = vpop.f32.mrb[15].mxu0  ;;  %v1519_v58 = vrot.slane %v4616_v19, %v4206_v52  ;;  %v2528_v52 = vld [vmem:[%s5340_s3 + $0x100] sm:$0xff] }
 0xcc1   :  { %v1417_v4 = vadd.f32 %v1413_v55, %v1401_v1  ;;  %v1387_v6 = vmul.f32 %v1383_v28, %v1287_v53  ;;  %v1415_v7 = vmul.f32 %v1411_v30, %v1373_v3 }
 0xcc2   :  { %v1428_v8 = vadd.f32 %v1423_v50, %v1416_v63  ;;  %v1402_v34 = vadd.f32 %v1398_v59, %v1386_v12 }
 0xcc3   :  { %v1429_v9 = vadd.f32 %v1427_v0, %v1417_v4  ;;  %v1403_v10 = vadd.f32 %v1399_v11, %v1387_v6 }
 0xcc4   :  { %v1440_v14 = vmul.f32 %v1435_v2, %v1428_v8  ;;  %v1418_v15 = vadd.f32 %v1414_v54, %v1402_v34 }
 0xcc5   :  { %v1441_v16 = vmul.f32 %v1439_v5, %v1429_v9  ;;  %v1419_v20 = vadd.f32 %v1415_v7, %v1403_v10 }
 0xcc6   :  { %v1452_v21 = vadd.f32 %v1447_v17, %v1440_v14  ;;  %v1430_v33 = vadd.f32 %v1423_v50, %v1418_v15  ;;  %v2530_v14 = vld [vmem:[%s5340_s3 + $0x110] sm:$0xff]  ;;  %v2531_v15 = vld [vmem:[%s5340_s3 + $0x118] sm:$0xff] }
 0xcc7   :  { %v1431_v22 = vadd.f32 %v1427_v0, %v1419_v20  ;;  %v1453_v23 = vadd.f32 %v1451_v13, %v1441_v16  ;;  %v3538_v16 = vpack.c.bf16 %v2531_v15, %v2530_v14  ;;  %v2532_v20 = vld [vmem:[%s5340_s3 + $0x120] sm:$0xff]  ;;  %v2555_v14 = vld [vmem:[%s5340_s3 + $0x1c8] sm:$0xff] }
 0xcc8   :  { %v2524_v39 = vmul.f32 -1.442695, %v1452_v21  ;;  %v1442_v24 = vmul.f32 %v1435_v2, %v1430_v33 }
 0xcc9   :  { %v1443_v26 = vmul.f32 %v1439_v5, %v1431_v22  ;;  %v2525_v48 = vmul.f32 -1.442695, %v1453_v23  ;;  %v2529_v5 = vld [vmem:[%s5340_s3 + $0x108] sm:$0xff]  ;;  %v2534_v22 = vld [vmem:[%s5340_s3 + $0x130] sm:$0xff] }
 0xcca   :  { %3811 = vpow2.f32 %v2524_v39  ;;  %v1454_v51 = vadd.f32 %v1447_v17, %v1442_v24  ;;  %v2536_v24 = vld [vmem:[%s5340_s3 + $0x140] sm:$0xff] }
 0xccb   :  { %3813 = vpow2.f32 %v2525_v48  ;;  %v1455_v27 = vadd.f32 %v1451_v13, %v1443_v26  ;;  %v2537_v26 = vld [vmem:[%s5340_s3 + $0x148] sm:$0xff] }
 0xccc   :  { %v2526_v36 = vmul.f32 -1.442695, %v1454_v51  ;;  %v3550_v48 = vpack.c.bf16 %v2537_v26, %v2536_v24  ;;  %v2561_v24 = vld [vmem:[%s5340_s3 + $0x1f8] sm:$0xff] }
 0xccd   :  { %v2527_v28 = vmul.f32 -1.442695, %v1455_v27 }
 0xcce   :  { %3815 = vpow2.f32 %v2526_v36  ;;  %v2540_v36 = vld [vmem:[%s5340_s3 + $0x160] sm:$0xff] }
 0xccf   :  { %3817 = vpow2.f32 %v2527_v28 }
 0xcd4   :  { %v3812_v35 = vpop.eup %3811 }
 0xcd5   :  { %v3814_v29 = vpop.eup %3813  ;;  %v1468_v30 = vadd.f32 1.0, %v3812_v35  ;;  %v2541_v35 = vld [vmem:[%s5340_s3 + $0x168] sm:$0xff] }
 0xcd6   :  { %v1469_v31 = vadd.f32 1.0, %v3814_v29  ;;  %v3558_v29 = vpack.c.bf16 %v2541_v35, %v2540_v36 }
 0xcd7   :  { %3819 = vrcp.f32 %v1468_v30  ;;  %v2542_v30 = vld [vmem:[%s5340_s3 + $0x170] sm:$0xff] }
 0xcd8   :  { %v3816_v32 = vpop.eup %3815  ;;  %3821 = vrcp.f32 %v1469_v31  ;;  %v2543_v31 = vld [vmem:[%s5340_s3 + $0x178] sm:$0xff] }
 0xcd9   :  { %v3818_v37 = vpop.eup %3817  ;;  %v1470_v40 = vadd.f32 1.0, %v3816_v32  ;;  %v3562_v32 = vpack.c.bf16 %v2543_v31, %v2542_v30 }
 0xcda   :  { %v1471_v44 = vadd.f32 1.0, %v3818_v37 }
 0xcdb   :  { %3823 = vrcp.f32 %v1470_v40 }
 0xcdc   :  { %3825 = vrcp.f32 %v1471_v44 }
 0xce1   :  { %v3820_v45 = vpop.eup %3819 }
 0xce2   :  { %v3822_v46 = vpop.eup %3821  ;;  %v1480_v49 = vmul.f32 %v3820_v45, %v1452_v21  ;;  %v2533_v21 = vld [vmem:[%s5340_s3 + $0x128] sm:$0xff] }
 0xce3   :  { %v1481_v47 = vmul.f32 %v3822_v46, %v1453_v23  ;;  %v3542_v33 = vpack.c.bf16 %v2533_v21, %v2532_v20  ;;  %v2535_v23 = vld [vmem:[%s5340_s3 + $0x138] sm:$0xff] }
 0xce4   :  { %v3546_v39 = vpack.c.bf16 %v2535_v23, %v2534_v22  ;;  %v2557_v20 = vld [vmem:[%s5340_s3 + $0x1d8] sm:$0xff]  ;;  %v2559_v22 = vld [vmem:[%s5340_s3 + $0x1e8] sm:$0xff] }
 0xce5   :  { %v3824_v55 = vpop.eup %3823  ;;  %1584 = vmatprep.mubr.f32.mxu1 %v1481_v47 }
 0xce6   :  { %v3826_v56 = vpop.eup %3825  ;;  %1585 = vmatmul.mubr.f32.vlgmr.msra.gmra.mrb[14].mxu1 %v1480_v49  ;;  %v1482_v1 = vmul.f32 %v3824_v55, %v1454_v51  ;;  %v2538_v51 = vld [vmem:[%s5340_s3 + $0x150] sm:$0xff] }
 0xce7   :  { %v1483_v50 = vmul.f32 %v3826_v56, %v1455_v27  ;;  %v2539_v27 = vld [vmem:[%s5340_s3 + $0x158] sm:$0xff] }
 0xce8   :  { %v3554_v28 = vpack.c.bf16 %v2539_v27, %v2538_v51 }
 0xce9   :  { %1589 = vmatprep.mubr.f32.mxu1 %v1483_v50 }
 0xcea   :  { %1590 = vmatmul.mubr.f32.gmra.mrb[16].mxu1 %v1482_v1 }
 0xdb9   :  { %v2749_v0 = vpop.f32.mrb[14].mxu1 }
 0xdba   :  { %v2750_v59 = vpop.f32.mrb[15].mxu1 }
 0xdbb   :  { %v2751_v11 = vadd.f32 %v2750_v59, %v2749_v0 }
 0xdbd   :  { %v1587_v60 = vadd.f32 %v2751_v11, %v1519_v58  ;;  %v2752_v63 = vpop.f32.mrb[16].mxu1 }
 0xdbe   :  { %v2753_v2 = vpop.f32.mrb[17].mxu1 }
 0xdbf   :  { %v2754_v12 = vadd.f32 %v2753_v2, %v2752_v63  ;;  %v4805_v53 = vadd.f32 %v1587_v60, %v4393_v62  ;;  %v3534_v62 = vpack.c.bf16 %v2529_v5, %v2528_v52  ;;  %v1636_v60 = vrot.slane %v4616_v19, %v4268_v41  ;;  %v2546_v5 = vld [vmem:[%s5340_s3 + $0x180] sm:$0xff]  ;;  %v2548_v41 = vld [vmem:[%s5340_s3 + $0x190] sm:$0xff] }
 0xdc1   :  { %v1592_v54 = vadd.f32 %v2754_v12, %v1519_v58  ;;  %1597 = vadd.xlane.f32.xlu0 %v4805_v53  ;;  %3535 = vmatprep.subr.bf16.mxu0 %v3534_v62  ;;  %v1630_v58 = vrot.slane %v4616_v19, %v4263_v25  ;;  %v2547_v25 = vld [vmem:[%s5340_s3 + $0x188] sm:$0xff] }
 0xdc2   :  { %3537 = vmatpush3.bf16.msra.mxu0 %v3534_v62  ;;  %v3566_v62 = vpack.c.bf16 %v2547_v25, %v2546_v5 }
 0xdc3   :  { %v4809_v3 = vadd.f32 %v1592_v54, %v4391_v61  ;;  %3539 = vmatprep.subr.bf16.mxu0 %v3538_v16 }
 0xdc4   :  { %3567 = vmatprep.subr.bf16.mxu1 %v3566_v62 }
 0xdc5   :  { %v1599_v4 = vsel %vm110_vm0, %v4809_v3, 0.0  ;;  %3569 = vmatpush3.bf16.msra.mxu1 %v3566_v62  ;;  %v2564_v62 = vld [vmem:[%s5350_s13 + $0x80] sm:$0xff] }
 0xdc6   :  { %1600 = vadd.xlane.f32.xlu0 %v1599_v4  ;;  %3541 = vmatpush3.bf16.msra.mxu0 %v3538_v16  ;;  %v2556_v16 = vld [vmem:[%s5340_s3 + $0x1d0] sm:$0xff] }
 0xdc7   :  { %3543 = vmatprep.subr.bf16.mxu0 %v3542_v33  ;;  %v3586_v21 = vpack.c.bf16 %v2557_v20, %v2556_v16  ;;  %v2569_v16 = vld [vmem:[%s5350_s13 + $0xa8] sm:$0xff] }
 0xdca   :  { %3545 = vmatpush3.bf16.msra.mxu0 %v3542_v33  ;;  %v2558_v33 = vld [vmem:[%s5340_s3 + $0x1e0] sm:$0xff] }
 0xdcb   :  { %3547 = vmatprep.subr.bf16.mxu0 %v3546_v39  ;;  %v3590_v23 = vpack.c.bf16 %v2559_v22, %v2558_v33  ;;  %v1913_v33 = vld [vmem:[%s5350_s13 + $0x38] sm:$0xff] }
 0xdce   :  { %3549 = vmatpush3.bf16.msra.mxu0 %v3546_v39  ;;  %v2560_v39 = vld [vmem:[%s5340_s3 + $0x1f0] sm:$0xff] }
 0xdcf   :  { %3551 = vmatprep.subr.bf16.mxu0 %v3550_v48  ;;  %v3594_v26 = vpack.c.bf16 %v2561_v24, %v2560_v39  ;;  %v2571_v39 = vld [vmem:[%s5350_s13 + $0xb8] sm:$0xff] }
 0xdd2   :  { %3553 = vmatpush3.bf16.msra.mxu0 %v3550_v48  ;;  %v1659_v48 = vrot.slane %v4616_v19, %v4339_v42  ;;  %v1769_v42 = vrot.slane %v4616_v19, %v4342_v43  ;;  %v1907_v43 = vld [vmem:[%s5350_s13 + $0x8] sm:$0xff] }
 0xdd3   :  { %3555 = vmatprep.subr.bf16.mxu0 %v3554_v28 }
 0xdd6   :  { %3557 = vmatpush3.bf16.msra.mxu0 %v3554_v28 }
 0xdd7   :  { %3559 = vmatprep.subr.bf16.mxu0 %v3558_v29 }
 0xdda   :  { %3561 = vmatpush3.bf16.msra.mxu0 %v3558_v29 }
 0xddb   :  { %3563 = vmatprep.subr.bf16.mxu0 %v3562_v32 }
 0xdde   :  { %3565 = vmatpush3.bf16.msra.mxu0 %v3562_v32 }
 0xe4e   :  { %v1598_v6 = vpop.xlane.xlu0 %1597 }
 0xe4f   :  { %v1602_v7 = vmul.f32 0.00990099, %v1598_v6  ;;  %v2549_v6 = vld [vmem:[%s5340_s3 + $0x198] sm:$0xff] }
 0xe51   :  { %v1604_v61 = vsub.f32 %v4805_v53, %v1602_v7  ;;  %v1613_v37 = vmul.f32 27.0, %v1602_v7 }
 0xe53   :  { %v1601_v8 = vpop.xlane.xlu0 %1600  ;;  %v1606_v17 = vmul.f32 %v1604_v61, %v1604_v61  ;;  %v1615_v40 = vmul.f32 %v1613_v37, %v1602_v7  ;;  %v3570_v7 = vpack.c.bf16 %v2549_v6, %v2548_v41  ;;  %v2565_v41 = vld [vmem:[%s5350_s13 + $0x88] sm:$0xff] }
 0xe54   :  { %v1603_v34 = vmul.f32 0.00990099, %v1601_v8  ;;  %v2551_v8 = vld [vmem:[%s5340_s3 + $0x1a8] sm:$0xff]  ;;  %v3599_v6 = vpack.c.bf16 %v2565_v41, %v2564_v62 }
 0xe55   :  { %1608 = vadd.xlane.f32.xlu0 %v1606_v17  ;;  %3571 = vmatprep.subr.bf16.mxu1 %v3570_v7 }
 0xe56   :  { %v1605_v9 = vsub.f32 %v4809_v3, %v1603_v34  ;;  %v1614_v46 = vmul.f32 27.0, %v1603_v34  ;;  %3573 = vmatpush3.bf16.msra.mxu1 %v3570_v7  ;;  %v1908_v7 = vld [vmem:[%s5350_s13 + $0x10] sm:$0xff] }
 0xe58   :  { %v1607_v10 = vmul.f32 %v1605_v9, %v1605_v9  ;;  %v1616_v55 = vmul.f32 %v1614_v46, %v1603_v34  ;;  %v2552_v34 = vld [vmem:[%s5340_s3 + $0x1b0] sm:$0xff] }
 0xe5a   :  { %v1610_v13 = vsel %vm110_vm0, %v1607_v10, 0.0 }
 0xe5b   :  { %1611 = vadd.xlane.f32.xlu1 %v1610_v13  ;;  %v2554_v13 = vld [vmem:[%s5340_s3 + $0x1c0] sm:$0xff] }
 0xe5c   :  { %v3582_v15 = vpack.c.bf16 %v2555_v14, %v2554_v13  ;;  %v1911_v13 = vld [vmem:[%s5350_s13 + $0x28] sm:$0xff] }
 0xee2   :  { %v1609_v44 = vpop.xlane.xlu0 %1608 }
 0xee3   :  { %v1617_v45 = vsub.f32 %v1609_v44, %v1615_v40 }
 0xee5   :  { %v1619_v47 = vmul.f32 0.00990099, %v1617_v45 }
 0xee7   :  { %v1621_v49 = vadd.f32 1e-05, %v1619_v47 }
 0xee8   :  { %v1612_v56 = vpop.xlane.xlu1 %1611 }
 0xee9   :  { %3827 = vrsqrt.f32 %v1621_v49  ;;  %v1618_v50 = vsub.f32 %v1612_v56, %v1616_v55 }
 0xeeb   :  { %v1620_v1 = vmul.f32 0.00990099, %v1618_v50 }
 0xeed   :  { %v1622_v0 = vadd.f32 1e-05, %v1620_v1 }
 0xeef   :  { %3829 = vrsqrt.f32 %v1622_v0 }
 0xef3   :  { %v3828_v59 = vpop.eup %3827 }
 0xef4   :  { %v1625_v11 = vmul.f32 %v3828_v59, %v1604_v61  ;;  %v2550_v61 = vld [vmem:[%s5340_s3 + $0x1a0] sm:$0xff] }
 0xef5   :  { %v3574_v17 = vpack.c.bf16 %v2551_v8, %v2550_v61  ;;  %v1909_v61 = vld [vmem:[%s5350_s13 + $0x18] sm:$0xff] }
 0xef6   :  { %v1631_v63 = vmul.f32 %v1630_v58, %v1625_v11  ;;  %v1906_v11 = vld [vmem:[%s5350_s13] sm:$0xff]  ;;  %v3626_v8 = vpack.c.bf16 %v1909_v61, %v1908_v7  ;;  %v2581_v61 = vld [vmem:[%s5350_s13 + $0x108] sm:$0xff] }
 0xef7   :  { %3575 = vmatprep.subr.bf16.mxu1 %v3574_v17  ;;  %v2580_v7 = vld [vmem:[%s5350_s13 + $0x100] sm:$0xff] }
 0xef8   :  { %v1637_v2 = vadd.f32 %v1636_v60, %v1631_v63  ;;  %3577 = vmatpush3.bf16.msra.mxu1 %v3574_v17  ;;  %v3623_v63 = vpack.c.bf16 %v1907_v43, %v1906_v11  ;;  %v2566_v17 = vld [vmem:[%s5350_s13 + $0x90] sm:$0xff] }
 0xef9   :  { %v3830_v12 = vpop.eup %3829 }
 0xefa   :  { %v1626_v54 = vmul.f32 %v3830_v12, %v1605_v9  ;;  %3062 = vmatprep.mubr.f32.mxu0 %v1637_v2  ;;  %v2553_v9 = vld [vmem:[%s5340_s3 + $0x1b8] sm:$0xff] }
 0xefb   :  { %v3578_v10 = vpack.c.bf16 %v2553_v9, %v2552_v34  ;;  %v2567_v34 = vld [vmem:[%s5350_s13 + $0x98] sm:$0xff] }
 0xefc   :  { %v1632_v4 = vmul.f32 %v1630_v58, %v1626_v54  ;;  %v3602_v9 = vpack.c.bf16 %v2567_v34, %v2566_v17  ;;  %v2598_v34 = vld [vmem:[%s5350_s13 + $0x190] sm:$0xff] }
 0xefd   :  { %3579 = vmatprep.subr.bf16.mxu1 %v3578_v10 }
 0xefe   :  { %v1638_v52 = vadd.f32 %v1636_v60, %v1632_v4  ;;  %3581 = vmatpush3.bf16.msra.mxu1 %v3578_v10  ;;  %v3975_v60 = vmov 0.0|0.0   ;;  %v1910_v10 = vld [vmem:[%s5350_s13 + $0x20] sm:$0xff] }
 0xeff   :  { %3583 = vmatprep.subr.bf16.mxu1 %v3582_v15  ;;  %3598 = vmatprep.subr.bf16.mxu0 %v3975_v60  ;;  %v3629_v14 = vpack.c.bf16 %v1911_v13, %v1910_v10  ;;  %v3647_v13 = vpack.c.bf16 %v2581_v61, %v2580_v7 }
 0xf00   :  { %3063 = vmatmul.mubr.f32.vlgmr.msra.gmra.mrb[16].mxu0 %v1638_v52 }
 0xf01   :  { %3600 = vmatpush3.bf16.msra.mxu0 %v3599_v6  ;;  %3132 = vmatprep.mubr.msk.f32.mxu0 %vm3976_vm9, %v3974_v38 }
 0xf02   :  { %3585 = vmatpush3.bf16.msra.mxu1 %v3582_v15  ;;  %3601 = vmatprep.subr.bf16.mxu0 %v3975_v60  ;;  %v2568_v15 = vld [vmem:[%s5350_s13 + $0xa0] sm:$0xff] }
 0xf03   :  { %3587 = vmatprep.subr.bf16.mxu1 %v3586_v21  ;;  %v3605_v20 = vpack.c.bf16 %v2569_v16, %v2568_v15  ;;  %v2582_v15 = vld [vmem:[%s5350_s13 + $0x110] sm:$0xff]  ;;  %v2583_v16 = vld [vmem:[%s5350_s13 + $0x118] sm:$0xff] }
 0xf05   :  { %3603 = vmatpush3.bf16.msra.mxu0 %v3602_v9  ;;  %v2599_v9 = vld [vmem:[%s5350_s13 + $0x198] sm:$0xff] }
 0xf06   :  { %3589 = vmatpush3.bf16.msra.mxu1 %v3586_v21  ;;  %3604 = vmatprep.subr.bf16.mxu0 %v3975_v60  ;;  %v1912_v21 = vld [vmem:[%s5350_s13 + $0x30] sm:$0xff] }
 0xf07   :  { %3591 = vmatprep.subr.bf16.mxu1 %v3590_v23  ;;  %v3632_v22 = vpack.c.bf16 %v1913_v33, %v1912_v21  ;;  %v2600_v21 = vld [vmem:[%s5350_s13 + $0x1a0] sm:$0xff]  ;;  %v2601_v33 = vld [vmem:[%s5350_s13 + $0x1a8] sm:$0xff] }
 0xf09   :  { %3606 = vmatpush3.bf16.msra.mxu0 %v3605_v20  ;;  %v3674_v20 = vpack.c.bf16 %v2599_v9, %v2598_v34 }
 0xf0a   :  { %3593 = vmatpush3.bf16.msra.mxu1 %v3590_v23  ;;  %3607 = vmatprep.subr.bf16.mxu0 %v3975_v60  ;;  %v2570_v23 = vld [vmem:[%s5350_s13 + $0xb0] sm:$0xff] }
 0xf0b   :  { %3595 = vmatprep.subr.bf16.mxu1 %v3594_v26  ;;  %v3608_v24 = vpack.c.bf16 %v2571_v39, %v2570_v23  ;;  %v2584_v39 = vld [vmem:[%s5350_s13 + $0x120] sm:$0xff] }
 0xf0d   :  { %3609 = vmatpush3.bf16.msra.mxu0 %v3608_v24  ;;  %v2585_v24 = vld [vmem:[%s5350_s13 + $0x128] sm:$0xff] }
 0xf0e   :  { %3597 = vmatpush3.bf16.msra.mxu1 %v3594_v26  ;;  %v1914_v26 = vld [vmem:[%s5350_s13 + $0x40] sm:$0xff]  ;;  %3610 = vmatprep.subr.bf16.mxu0 %v3975_v60 }
 0xf0f   :  { %3622 = vmatprep.subr.bf16.mxu1 %v3975_v60 }
 0xfd3   :  { %v3064_v51 = vpop.f32.mrb[16].mxu0 }
 0xfd4   :  { %v1732_v27 = vadd.f32 %v3064_v51, %v1659_v48  ;;  %v1726_v36 = vpop.f32.mrb[17].mxu0 }
 0xfd5   :  { %v1727_v28 = vadd.f32 %v1726_v36, %v1659_v48  ;;  %v1915_v48 = vld [vmem:[%s5350_s13 + $0x48] sm:$0xff] }
 0xfd6   :  { %v2545_v35 = vmul.f32 -1.442695, %v1732_v27  ;;  %v3635_v51 = vpack.c.bf16 %v1915_v48, %v1914_v26  ;;  %v2573_v36 = vld [vmem:[%s5350_s13 + $0xc8] sm:$0xff]  ;;  %v3677_v26 = vpack.c.bf16 %v2601_v33, %v2600_v21  ;;  %v2602_v48 = vld [vmem:[%s5350_s13 + $0x1b0] sm:$0xff] }
 0xfd7   :  { %v2544_v29 = vmul.f32 -1.442695, %v1727_v28 }
 0xfd8   :  { %3831 = vpow2.f32 %v2545_v35  ;;  %v1916_v35 = vld [vmem:[%s5350_s13 + $0x50] sm:$0xff] }
 0xfd9   :  { %3833 = vpow2.f32 %v2544_v29  ;;  %v1917_v29 = vld [vmem:[%s5350_s13 + $0x58] sm:$0xff] }
 0xfe2   :  { %v3832_v30 = vpop.eup %3831 }
 0xfe3   :  { %v3834_v31 = vpop.eup %3833  ;;  %v1742_v32 = vadd.f32 1.0, %v3832_v30  ;;  %v3638_v30 = vpack.c.bf16 %v1917_v29, %v1916_v35  ;;  %v2586_v35 = vld [vmem:[%s5350_s13 + $0x130] sm:$0xff]  ;;  %v2587_v29 = vld [vmem:[%s5350_s13 + $0x138] sm:$0xff] }
 0xfe4   :  { %v1741_v37 = vadd.f32 1.0, %v3834_v31  ;;  %v2574_v31 = vld [vmem:[%s5350_s13 + $0xd0] sm:$0xff] }
 0xfe5   :  { %3835 = vrcp.f32 %v1742_v32  ;;  %v2575_v32 = vld [vmem:[%s5350_s13 + $0xd8] sm:$0xff] }
 0xfe6   :  { %3837 = vrcp.f32 %v1741_v37  ;;  %v3614_v37 = vpack.c.bf16 %v2575_v32, %v2574_v31  ;;  %v2604_v32 = vld [vmem:[%s5350_s13 + $0x1c0] sm:$0xff] }
 0xfef   :  { %v3836_v40 = vpop.eup %3835 }
 0xff0   :  { %v3838_v44 = vpop.eup %3837  ;;  %v1748_v46 = vmul.f32 %v3836_v40, %v1732_v27  ;;  %v2572_v27 = vld [vmem:[%s5350_s13 + $0xc0] sm:$0xff] }
 0xff1   :  { %v1747_v45 = vmul.f32 %v3838_v44, %v1727_v28  ;;  %v3611_v28 = vpack.c.bf16 %v2573_v36, %v2572_v27  ;;  %v1918_v40 = vld [vmem:[%s5350_s13 + $0x60] sm:$0xff]  ;;  %v1919_v44 = vld [vmem:[%s5350_s13 + $0x68] sm:$0xff]  ;;  %v3653_v36 = vpack.c.bf16 %v2585_v24, %v2584_v39 }
 0xff3   :  { %3097 = vmatprep.mubr.f32.mxu1 %v1747_v45  ;;  %3612 = vmatpush3.bf16.msra.mxu0 %v3611_v28  ;;  %v3641_v45 = vpack.c.bf16 %v1919_v44, %v1918_v40  ;;  %v2588_v40 = vld [vmem:[%s5350_s13 + $0x140] sm:$0xff]  ;;  %v2589_v44 = vld [vmem:[%s5350_s13 + $0x148] sm:$0xff] }
 0xff4   :  { %3098 = vmatmul.mubr.f32.vlgmr.msra.gmra.mrb[18].mxu1 %v1748_v46  ;;  %3613 = vmatprep.subr.bf16.mxu0 %v3975_v60  ;;  %v2576_v46 = vld [vmem:[%s5350_s13 + $0xe0] sm:$0xff] }
 0xff5   :  { %3624 = vmatpush3.bf16.msra.mxu1 %v3623_v63  ;;  %3167 = vmatprep.mubr.msk.f32.mxu1 %vm3976_vm9, %v3974_v38 }
 0xff6   :  { %3625 = vmatprep.subr.bf16.mxu1 %v3975_v60 }
 0xff7   :  { %3615 = vmatpush3.bf16.msra.mxu0 %v3614_v37  ;;  %v3656_v37 = vpack.c.bf16 %v2587_v29, %v2586_v35  ;;  %v2620_v29 = vld [vmem:[%s5350_s13 + $0x240] sm:$0xff] }
 0xff8   :  { %3616 = vmatprep.subr.bf16.mxu0 %v3975_v60 }
 0xff9   :  { %3627 = vmatpush3.bf16.msra.mxu1 %v3626_v8 }
 0xffa   :  { %3628 = vmatprep.subr.bf16.mxu1 %v3975_v60 }
 0xffd   :  { %3630 = vmatpush3.bf16.msra.mxu1 %v3629_v14 }
 0xffe   :  { %3631 = vmatprep.subr.bf16.mxu1 %v3975_v60 }
0x1001   :  { %3633 = vmatpush3.bf16.msra.mxu1 %v3632_v22  ;;  %v3650_v22 = vpack.c.bf16 %v2583_v16, %v2582_v15  ;;  %v2615_v15 = vld [vmem:[%s5350_s13 + $0x218] sm:$0xff] }
0x1002   :  { %3634 = vmatprep.subr.bf16.mxu1 %v3975_v60 }
0x1005   :  { %3636 = vmatpush3.bf16.msra.mxu1 %v3635_v51  ;;  %v2603_v51 = vld [vmem:[%s5350_s13 + $0x1b8] sm:$0xff] }
0x1006   :  { %3637 = vmatprep.subr.bf16.mxu1 %v3975_v60 }
0x1009   :  { %3639 = vmatpush3.bf16.msra.mxu1 %v3638_v30  ;;  %v3680_v30 = vpack.c.bf16 %v2603_v51, %v2602_v48  ;;  %v2618_v48 = vld [vmem:[%s5350_s13 + $0x230] sm:$0xff]  ;;  %v2619_v51 = vld [vmem:[%s5350_s13 + $0x238] sm:$0xff] }
0x100a   :  { %3640 = vmatprep.subr.bf16.mxu1 %v3975_v60  ;;  %v3704_v35 = vpack.c.bf16 %v2619_v51, %v2618_v48 }
0x100d   :  { %3642 = vmatpush3.bf16.msra.mxu1 %v3641_v45 }
0x100e   :  { %3643 = vmatprep.subr.bf16.mxu1 %v3975_v60 }
0x10c7   :  { %v3099_v47 = vpop.f32.mrb[18].mxu1 }
0x10c8   :  { %v1842_v49 = vadd.f32 %v3099_v47, %v1769_v42  ;;  %v1836_v55 = vpop.f32.mrb[19].mxu1  ;;  %v1920_v47 = vld [vmem:[%s5350_s13 + $0x70] sm:$0xff] }
0x10c9   :  { %v1837_v56 = vadd.f32 %v1836_v55, %v1769_v42  ;;  %v2577_v42 = vld [vmem:[%s5350_s13 + $0xe8] sm:$0xff]  ;;  %v1921_v55 = vld [vmem:[%s5350_s13 + $0x78] sm:$0xff] }
0x10ca   :  { %v1846_v50 = vmul.f32 0.5, %v1842_v49  ;;  %v3617_v49 = vpack.c.bf16 %v2577_v42, %v2576_v46  ;;  %v2606_v42 = vld [vmem:[%s5350_s13 + $0x1d0] sm:$0xff] }
0x10cb   :  { %v1845_v1 = vmul.f32 0.5, %v1837_v56  ;;  %v2578_v56 = vld [vmem:[%s5350_s13 + $0xf0] sm:$0xff] }
0x10cc   :  { %v1848_v0 = vadd.f32 %v1846_v50, %v4809_v3  ;;  %v2579_v50 = vld [vmem:[%s5350_s13 + $0xf8] sm:$0xff]  ;;  %3618 = vmatpush3.bf16.msra.mxu0 %v3617_v49  ;;  %v3659_v49 = vpack.c.bf16 %v2589_v44, %v2588_v40  ;;  %v2622_v44 = vld [vmem:[%s5350_s13 + $0x250] sm:$0xff] }
0x10cd   :  { %v1847_v58 = vadd.f32 %v1845_v1, %v4805_v53  ;;  %v3644_v1 = vpack.c.bf16 %v1921_v55, %v1920_v47  ;;  %3619 = vmatprep.subr.bf16.mxu0 %v3975_v60  ;;  %v2607_v47 = vld [vmem:[%s5350_s13 + $0x1d8] sm:$0xff]  ;;  %v2590_v55 = vld [vmem:[%s5350_s13 + $0x150] sm:$0xff] }
0x10ce   :  { %v1851_v59 = vsel %vm110_vm0, %v1848_v0, 0.0 }
0x10cf   :  { %1852 = vadd.xlane.f32.xlu1 %v1851_v59  ;;  %1849 = vadd.xlane.f32.xlu0 %v1847_v58 }
0x10d0   :  { %3645 = vmatpush3.bf16.msra.mxu1 %v3644_v1 }
0x10d1   :  { %3670 = vmatprep.subr.bf16.mxu1 %v3975_v60 }
0x115c   :  { %v1853_v53 = vpop.xlane.xlu1 %1852  ;;  %v1850_v3 = vpop.xlane.xlu0 %1849 }
0x115d   :  { %v4932_v2 = vmul.f32 0.00990099, %v1853_v53  ;;  %v4934_v12 = vmul.f32 0.00990099, %v1850_v3  ;;  %v5060_v3 = vrot.slane %v4616_v19, %v4385_v57  ;;  %v2562_v57 = vld [vmem:[%s5349_s12 + $0x10] sm:$0xff] }
0x115f   :  { %v4937_v54 = vsub.f32 %v1847_v58, %v4934_v12  ;;  %v4940_v4 = vsub.f32 %v1848_v0, %v4932_v2  ;;  %v3620_v0 = vpack.c.bf16 %v2579_v50, %v2578_v56  ;;  %v1865_v58 = vmul.f32 27.0, %v4934_v12  ;;  %v2591_v56 = vld [vmem:[%s5350_s13 + $0x158] sm:$0xff] }
0x1160   :  { %v1866_v23 = vmul.f32 27.0, %v4932_v2  ;;  %v3686_v50 = vpack.c.bf16 %v2607_v47, %v2606_v42  ;;  %v2640_v47 = vld [vmem:[%s5350_s13 + $0x2e0] sm:$0xff] }
0x1161   :  { %v1858_v52 = vmul.f32 %v4937_v54, %v4937_v54  ;;  %v1859_v5 = vmul.f32 %v4940_v4, %v4940_v4  ;;  %3621 = vmatpush3.bf16.msra.mxu0 %v3620_v0  ;;  %v1867_v59 = vmul.f32 %v1865_v58, %v4934_v12  ;;  %v1891_v12 = vld [vmem:[%s5349_s12] sm:$0xff]  ;;  %v2609_v58 = vld [vmem:[%s5350_s13 + $0x1e8] sm:$0xff] }
0x1162   :  { %3646 = vmatprep.subr.bf16.mxu0 %v3975_v60  ;;  %v1868_v28 = vmul.f32 %v1866_v23, %v4932_v2  ;;  %v2605_v2 = vld [vmem:[%s5350_s13 + $0x1c8] sm:$0xff]  ;;  %v2608_v0 = vld [vmem:[%s5350_s13 + $0x1e0] sm:$0xff] }
0x1163   :  { %1860 = vadd.xlane.f32.xlu0 %v1858_v52  ;;  %v1862_v25 = vsel %vm110_vm0, %v1859_v5, 0.0  ;;  %v3683_v45 = vpack.c.bf16 %v2605_v2, %v2604_v32  ;;  %v2617_v23 = vld [vmem:[%s5350_s13 + $0x228] sm:$0xff]  ;;  %v2639_v2 = vld [vmem:[%s5350_s13 + $0x2d8] sm:$0xff] }
0x1164   :  { %1863 = vadd.xlane.f32.xlu1 %v1862_v25  ;;  %v5065_v25 = vrot.slane %v4616_v19, %v4614_v18  ;;  %v2597_v18 = vld [vmem:[%s5350_s13 + $0x188] sm:$0xff] }
0x11f0   :  { %v1861_v11 = vpop.xlane.xlu0 %1860 }
0x11f1   :  { %v1869_v43 = vsub.f32 %v1861_v11, %v1867_v59  ;;  %v1864_v27 = vpop.xlane.xlu1 %1863  ;;  %v3662_v59 = vpack.c.bf16 %v2591_v56, %v2590_v55  ;;  %v2592_v11 = vld [vmem:[%s5350_s13 + $0x160] sm:$0xff] }
0x11f2   :  { %v1870_v31 = vsub.f32 %v1864_v27, %v1868_v28 }
0x11f3   :  { %v1871_v63 = vmul.f32 0.00990099, %v1869_v43  ;;  %v2593_v43 = vld [vmem:[%s5350_s13 + $0x168] sm:$0xff] }
0x11f4   :  { %v1872_v46 = vmul.f32 0.00990099, %v1870_v31  ;;  %v1892_v31 = vld [vmem:[%s5349_s12 + $0x8] sm:$0xf] }
0x11f5   :  { %v1873_v53 = vadd.f32 1e-05, %v1871_v63  ;;  %v3689_v63 = vpack.c.bf16 %v2609_v58, %v2608_v0  ;;  %v2642_v58 = vld [vmem:[%s5350_s13 + $0x2f0] sm:$0xff] }
0x11f6   :  { %v1874_v1 = vadd.f32 1e-05, %v1872_v46  ;;  %v2563_v46 = vld [vmem:[%s5349_s12 + $0x18] sm:$0xf] }
0x11f7   :  { %3839 = vrsqrt.f32 %v1873_v53  ;;  %v2610_v53 = vld [vmem:[%s5350_s13 + $0x1f0] sm:$0xff] }
0x11f8   :  { %3841 = vrsqrt.f32 %v1874_v1  ;;  %v2625_v1 = vld [vmem:[%s5350_s13 + $0x268] sm:$0xff] }
0x1201   :  { %v3840_v52 = vpop.eup %3839 }
0x1202   :  { %v1877_v5 = vmul.f32 %v3840_v52, %v4937_v54  ;;  %v2596_v54 = vld [vmem:[%s5350_s13 + $0x180] sm:$0xff]  ;;  %v2611_v52 = vld [vmem:[%s5350_s13 + $0x1f8] sm:$0xff]  ;;  %v3842_v9 = vpop.eup %3841 }
0x1203   :  { %v3671_v17 = vpack.c.bf16 %v2597_v18, %v2596_v54  ;;  %v2612_v18 = vld [vmem:[%s5350_s13 + $0x200] sm:$0xff]  ;;  %v1878_v21 = vmul.f32 %v3842_v9, %v4940_v4  ;;  %v2634_v4 = vld [vmem:[%s5350_s13 + $0x2b0] sm:$0xff] }
0x1204   :  { %v1883_v62 = vmul.f32 %v5060_v3, %v1877_v5  ;;  %v3665_v5 = vpack.c.bf16 %v2593_v43, %v2592_v11 }
0x1205   :  { %v1884_v24 = vmul.f32 %v5060_v3, %v1878_v21  ;;  %v2636_v3 = vld [vmem:[%s5350_s13 + $0x2c0] sm:$0xff] }
0x1206   :  { %v1889_v41 = vadd.f32 %v5065_v25, %v1883_v62  ;;  %v2594_v62 = vld [vmem:[%s5350_s13 + $0x170] sm:$0xff] }
0x1207   :  { %v1890_v28 = vadd.f32 %v5065_v25, %v1884_v24  ;;  %v2638_v25 = vld [vmem:[%s5350_s13 + $0x2d0] sm:$0xff] }
0x1208   :  { %v1893_v6 = vmul.f32 %v1891_v12, %v1889_v41  ;;  %v2595_v12 = vld [vmem:[%s5350_s13 + $0x178] sm:$0xff]  ;;  %v3692_v41 = vpack.c.bf16 %v2611_v52, %v2610_v53  ;;  %v3734_v42 = vpack.c.bf16 %v2639_v2, %v2638_v25 }
0x1209   :  { %v3668_v54 = vpack.c.bf16 %v2595_v12, %v2594_v62  ;;  %v1894_v40 = vmul.f32 %v1892_v31, %v1890_v28  ;;  %v2627_v53 = vld [vmem:[%s5350_s13 + $0x278] sm:$0xff] }
0x120a   :  { %v1898_v19 = vadd.f32 %v2562_v57, %v1893_v6  ;;  %v2628_v57 = vld [vmem:[%s5350_s13 + $0x280] sm:$0xff]  ;;  %v2629_v6 = vld [vmem:[%s5350_s13 + $0x288] sm:$0xff] }
0x120b   :  { %v3719_v7 = vpack.c.bf16 %v2629_v6, %v2628_v57  ;;  %v1899_v56 = vadd.f32 %v2563_v46, %v1894_v40 }
0x120c   :  { %vm1900_vm10 = vcmp.gt.f32.partialorder %v1898_v19, 0.0  ;;  %v1902_v8 = vmul.f32 0.2, %v1898_v19 }
0x120d   :  { %v1903_v43 = vmul.f32 0.2, %v1899_v56  ;;  %vm1901_vm11 = vcmp.gt.f32.partialorder %v1899_v56, 0.0 }
0x120e   :  { %v5093_v10 = vsel %vm1900_vm10, %v1898_v19, %v1902_v8  ;;  %v2613_v19 = vld [vmem:[%s5350_s13 + $0x208] sm:$0xff]  ;;  %v2630_v8 = vld [vmem:[%s5350_s13 + $0x290] sm:$0xff] }
0x120f   :  { %3168 = vmatmul.mubr.f32.vlgmr.msra.gmra.mrb[20].mxu1 %v5093_v10  ;;  %v1940_v14 = vrot.slane %v5093_v10, 2  ;;  %v2189_v61 = vrot.slane %v5093_v10, 6  ;;  %v3695_v34 = vpack.c.bf16 %v2613_v19, %v2612_v18  ;;  %v1905_v62 = vsel %vm1901_vm11, %v1899_v56, %v1903_v43 }
0x1210   :  { %3672 = vmatpush3.bf16.msra.mxu1 %v3671_v17  ;;  %3237 = vmatprep.mubr.msk.f32.mxu1 %vm3976_vm9, %v3974_v38  ;;  %v2631_v17 = vld [vmem:[%s5350_s13 + $0x298] sm:$0xff]  ;;  %v2368_v12 = vrot.slane %v1905_v62, 2 }
0x1211   :  { %3133 = vmatmul.mubr.f32.vlgmr.msra.gmra.mrb[18].mxu0 %v1940_v14  ;;  %3673 = vmatprep.subr.bf16.mxu1 %v3975_v60  ;;  %v2614_v14 = vld [vmem:[%s5350_s13 + $0x210] sm:$0xff]  ;;  %v3722_v16 = vpack.c.bf16 %v2631_v17, %v2630_v8 }
0x1212   :  { %3648 = vmatpush3.bf16.msra.mxu0 %v3647_v13  ;;  %3202 = vmatprep.mubr.msk.f32.mxu0 %vm3976_vm9, %v3974_v38  ;;  %v2099_v13 = vrot.slane %v5093_v10, 4  ;;  %v2632_v10 = vld [vmem:[%s5350_s13 + $0x2a0] sm:$0xff]  ;;  %v3698_v33 = vpack.c.bf16 %v2615_v15, %v2614_v14 }
0x1213   :  { %3649 = vmatprep.subr.bf16.mxu0 %v3975_v60 }
0x1214   :  { %3675 = vmatpush3.bf16.msra.mxu1 %v3674_v20  ;;  %v2633_v20 = vld [vmem:[%s5350_s13 + $0x2a8] sm:$0xff] }
0x1215   :  { %3676 = vmatprep.subr.bf16.mxu1 %v3975_v60  ;;  %v3725_v39 = vpack.c.bf16 %v2633_v20, %v2632_v10 }
0x1216   :  { %3651 = vmatpush3.bf16.msra.mxu0 %v3650_v22  ;;  %v2616_v22 = vld [vmem:[%s5350_s13 + $0x220] sm:$0xff] }
0x1217   :  { %3652 = vmatprep.subr.bf16.mxu0 %v3975_v60 }
0x1218   :  { %3678 = vmatpush3.bf16.msra.mxu1 %v3677_v26  ;;  %v3701_v26 = vpack.c.bf16 %v2617_v23, %v2616_v22 }
0x1219   :  { %3679 = vmatprep.subr.bf16.mxu1 %v3975_v60 }
0x121a   :  { %3654 = vmatpush3.bf16.msra.mxu0 %v3653_v36  ;;  %v2637_v36 = vld [vmem:[%s5350_s13 + $0x2c8] sm:$0xff] }
0x121b   :  { %3655 = vmatprep.subr.bf16.mxu0 %v3975_v60  ;;  %v3731_v32 = vpack.c.bf16 %v2637_v36, %v2636_v3 }
0x121c   :  { %3681 = vmatpush3.bf16.msra.mxu1 %v3680_v30  ;;  %v2621_v30 = vld [vmem:[%s5350_s13 + $0x248] sm:$0xff] }
0x121d   :  { %3682 = vmatprep.subr.bf16.mxu1 %v3975_v60 }
0x121e   :  { %3657 = vmatpush3.bf16.msra.mxu0 %v3656_v37  ;;  %v3707_v37 = vpack.c.bf16 %v2621_v30, %v2620_v29 }
0x121f   :  { %3658 = vmatprep.subr.bf16.mxu0 %v3975_v60 }
0x1220   :  { %3684 = vmatpush3.bf16.msra.mxu1 %v3683_v45  ;;  %v2623_v45 = vld [vmem:[%s5350_s13 + $0x258] sm:$0xff] }
0x1221   :  { %3685 = vmatprep.subr.bf16.mxu1 %v3975_v60  ;;  %v3710_v55 = vpack.c.bf16 %v2623_v45, %v2622_v44 }
0x1222   :  { %3660 = vmatpush3.bf16.msra.mxu0 %v3659_v49  ;;  %v2641_v49 = vld [vmem:[%s5350_s13 + $0x2e8] sm:$0xff] }
0x1223   :  { %3661 = vmatprep.subr.bf16.mxu0 %v3975_v60  ;;  %v3737_v0 = vpack.c.bf16 %v2641_v49, %v2640_v47 }
0x1224   :  { %3687 = vmatpush3.bf16.msra.mxu1 %v3686_v50  ;;  %v2624_v50 = vld [vmem:[%s5350_s13 + $0x260] sm:$0xff] }
0x1225   :  { %3688 = vmatprep.subr.bf16.mxu1 %v3975_v60  ;;  %v3713_v11 = vpack.c.bf16 %v2625_v1, %v2624_v50 }
0x1226   :  { %3663 = vmatpush3.bf16.msra.mxu0 %v3662_v59  ;;  %v2643_v59 = vld [vmem:[%s5350_s13 + $0x2f8] sm:$0xff] }
0x1227   :  { %3664 = vmatprep.subr.bf16.mxu0 %v3975_v60  ;;  %v3740_v52 = vpack.c.bf16 %v2643_v59, %v2642_v58 }
0x1228   :  { %3690 = vmatpush3.bf16.msra.mxu1 %v3689_v63  ;;  %v2626_v63 = vld [vmem:[%s5350_s13 + $0x270] sm:$0xff] }
0x1229   :  { %3691 = vmatprep.subr.bf16.mxu1 %v3975_v60 }
0x122a   :  { %3666 = vmatpush3.bf16.msra.mxu0 %v3665_v5  ;;  %v3716_v5 = vpack.c.bf16 %v2627_v53, %v2626_v63 }
0x122b   :  { %3667 = vmatprep.subr.bf16.mxu0 %v3975_v60 }
0x122c   :  { %3693 = vmatpush3.bf16.msra.mxu1 %v3692_v41 }
0x122d   :  { %3718 = vmatprep.subr.bf16.mxu1 %v3975_v60 }
0x122e   :  { %3669 = vmatpush3.bf16.msra.mxu0 %v3668_v54 }
0x122f   :  { %3238 = vmatmul.mubr.f32.vlgmr.msra.gmra.mrb[22].mxu1 %v2189_v61  ;;  %3694 = vmatprep.subr.bf16.mxu0 %v3975_v60 }
0x1230   :  { %3720 = vmatpush3.bf16.msra.mxu1 %v3719_v7  ;;  %3307 = vmatprep.mubr.msk.f32.mxu1 %vm3976_vm9, %v3974_v38 }
0x1231   :  { %3203 = vmatmul.mubr.f32.vlgmr.msra.gmra.mrb[20].mxu0 %v2099_v13  ;;  %3721 = vmatprep.subr.bf16.mxu1 %v3975_v60 }
0x1232   :  { %3696 = vmatpush3.bf16.msra.mxu0 %v3695_v34  ;;  %3272 = vmatprep.mubr.msk.f32.mxu0 %vm3976_vm9, %v3974_v38  ;;  %v2635_v38 = vld [vmem:[%s5350_s13 + $0x2b8] sm:$0xff] }
0x1233   :  { %3697 = vmatprep.subr.bf16.mxu0 %v3975_v60  ;;  %v3728_v27 = vpack.c.bf16 %v2635_v38, %v2634_v4 }
0x1234   :  { %3723 = vmatpush3.bf16.msra.mxu1 %v3722_v16  ;;  %v2644_v16 = vld [vmem:[%s5351_s14] ss:$0 sm:$0xff]  ;;  %s3935_s14 = scalar_lea.vmem %s2469_s25, 32 }
0x1235   :  { %3724 = vmatprep.subr.bf16.mxu1 %v3975_v60  ;;  %p3936_p4 = scmp.ne.s32.totalorder %s2469_s25, %s3935_s14  ;;  %p3941_p6 = scmp.lt.s32.totalorder %s3935_s14, %s3935_s14 }
0x1236   :  { %3699 = vmatpush3.bf16.msra.mxu0 %v3698_v33 }
0x1237   :  { %3700 = vmatprep.subr.bf16.mxu0 %v3975_v60  ;;  %p3942_p7 = por %p3941_p6, %p3940_p5 }
0x1238   :  { %3726 = vmatpush3.bf16.msra.mxu1 %v3725_v39 }
0x1239   :  { %3727 = vmatprep.subr.bf16.mxu1 %v3975_v60  ;;  %p3943_p8 = pnand %p3942_p7, %p3936_p4 }
0x123a   :  { %3702 = vmatpush3.bf16.msra.mxu0 %v3701_v26 }
0x123b   :  { %3703 = vmatprep.subr.bf16.mxu0 %v3975_v60 }
0x123c   :  { %3729 = vmatpush3.bf16.msra.mxu1 %v3728_v27 }
0x123d   :  { %3730 = vmatprep.subr.bf16.mxu1 %v3975_v60 }
0x123e   :  { %3705 = vmatpush3.bf16.msra.mxu0 %v3704_v35 }
0x123f   :  { %3706 = vmatprep.subr.bf16.mxu0 %v3975_v60 }
0x1240   :  { %3732 = vmatpush3.bf16.msra.mxu1 %v3731_v32 }
0x1241   :  { %3733 = vmatprep.subr.bf16.mxu1 %v3975_v60 }
0x1242   :  { %3708 = vmatpush3.bf16.msra.mxu0 %v3707_v37 }
0x1243   :  { %3709 = vmatprep.subr.bf16.mxu0 %v3975_v60 }
0x1244   :  { %3735 = vmatpush3.bf16.msra.mxu1 %v3734_v42 }
0x1245   :  { %3736 = vmatprep.subr.bf16.mxu1 %v3975_v60 }
0x1246   :  { %3711 = vmatpush3.bf16.msra.mxu0 %v3710_v55 }
0x1247   :  { %3712 = vmatprep.subr.bf16.mxu0 %v3975_v60 }
0x1248   :  { %3738 = vmatpush3.bf16.msra.mxu1 %v3737_v0 }
0x1249   :  { %3739 = vmatprep.subr.bf16.mxu1 %v3975_v60 }
0x124a   :  { %3714 = vmatpush3.bf16.msra.mxu0 %v3713_v11 }
0x124b   :  { %3715 = vmatprep.subr.bf16.mxu0 %v3975_v60 }
0x124c   :  { %3741 = vmatpush3.bf16.msra.mxu1 %v3740_v52 }
0x124e   :  { %3717 = vmatpush3.bf16.msra.mxu0 %v3716_v5 }
0x124f   :  { %3308 = vmatmul.mubr.f32.vlgmr.msra.gmra.mrb[24].mxu1 %v2368_v12 }
0x1251   :  { %3273 = vmatmul.mubr.f32.vlgmr.msra.gmra.mrb[22].mxu0 %v1905_v62 }
0x12e2   :  { %v2078_v41 = vpop.f32.mrb[20].mxu1 }
0x12e3   :  { %v3169_v57 = vpop.f32.mrb[21].mxu1 }
0x12e4   :  { %v2008_v6 = vpop.f32.mrb[18].mxu0 }
0x12e5   :  { %v2079_v54 = vadd.f32 %v2078_v41, %v2008_v6  ;;  %v3134_v18 = vpop.f32.mrb[19].mxu0 }
0x1302   :  { %v2257_v19 = vpop.f32.mrb[22].mxu1 }
0x1303   :  { %v3239_v7 = vpop.f32.mrb[23].mxu1 }
0x1304   :  { %v2167_v61 = vpop.f32.mrb[20].mxu0 }
0x1305   :  { %v2171_v8 = vadd.f32 %v2167_v61, %v2079_v54  ;;  %v3204_v17 = vpop.f32.mrb[21].mxu0 }
0x1307   :  { %v2261_v34 = vadd.f32 %v2257_v19, %v2171_v8 }
0x1322   :  { %v2436_v9 = vpop.f32.mrb[24].mxu1 }
0x1323   :  { %v3309_v13 = vpop.f32.mrb[25].mxu1 }
0x1324   :  { %v2345_v14 = vpop.f32.mrb[22].mxu0 }
0x1325   :  { %v2349_v60 = vadd.f32 %v2345_v14, %v2261_v34  ;;  %v3274_v15 = vpop.f32.mrb[23].mxu0 }
0x1327   :  { %v2440_v10 = vadd.f32 %v2436_v9, %v2349_v60 }
0x1329   :  { %v2448_v20 = vadd.f32 %v2644_v16, %v2440_v10 }
0x132b   :  { %v2450_v21 = vsel %vm2449_vm12, %v2448_v20, -inf }
0x132c   :  { %2451 = vmax.xlane.f32.xlu0 %v2450_v21 }
0x13b9   :  { %v2452_v33 = vpop.xlane.xlu0 %2451 }
0x13ba   :  { %v2453_v22 = vsub.f32 %v2448_v20, %v2452_v33 }
0x13bc   :  { %v2454_v23 = vmul.f32 1.442695, %v2453_v22 }
0x13be   :  { %3843 = vpow2.f32 %v2454_v23 }
0x13c8   :  { %v3844_v39 = vpop.eup %3843 }
0x13c9   :  { %v2456_v4 = vsel %vm2449_vm12, %v3844_v39, 0.0 }
0x13ca   :  { %2457 = vadd.xlane.f32.xlu1 %v2456_v4 }
0x1457   :  { %v2458_v38 = vpop.xlane.xlu1 %2457 }
0x1458   :  { %3845 = vrcp.f32 %v2458_v38 }
0x1462   :  { %v3846_v24 = vpop.eup %3845 }
0x1463   :  { %v2460_v26 = vmul.f32 %v3846_v24, %v3844_v39 }
0x1465   :  { %2461 = vst [vmem:[#allocation10] sm:$0x3] %v2460_v26 }
0x1466   :  { %3946 = shalt.err (!%p3943_p8)
}
0x1467   :  { %s3947_s5 = scalar_lea.hbm %s5352_s15, 32 }
0x1468   :  { %p3948_p9 = scmp.ne.s32.totalorder %s5352_s15, %s3947_s5  ;;  %p3951_p10 = scmp.lt.u32.totalorder %s3947_s5, %s5352_s15 }
0x146a   :  { %p3953_p11 = pnand %p3951_p10, %p3948_p9 }
0x146c   :  { %3956 = shalt.err (!%p3953_p11)
}
0x146d   :  { %2471 = dma.vmem_to_hbm [thread:$0]  %s2469_s25, 32, %s5352_s15, [#allocation4]  }
0x146e   :  { %3963 = dma.done.wait [#allocation4], 32  }
0x146f   :  { %3964 = vsyncadd [#allocation4], 4294967264 }
0x1470   :  { %2475 = vsyncpa [#allocation3], 1 }
0x1471   :  { %2476 = vsyncpa [#allocation6], 1 }
0x1472   :  { %2477 = vsyncpa [#allocation9], 1 }
0x1473   :  { %2478 = vsyncpa [#allocation4], 1 }

</bundles_post_ra>
